<compile_context>
chip_gen: v7x
topology: tpu7x:2x2x1
jax: 0.10.0
libtpu: 0.0.40
codegen_flags: <defaults>
</compile_context>

<pallas_src>
import jax
import jax.numpy as jnp
import numpy as np
from jax.experimental import pallas as pl
from jax.experimental.pallas import tpu as pltpu

# ---- model hyper-parameters (consistent with MelDecoder(dim=8)) ----
DIM = 8
D4 = 4 * DIM                 # proj input width  = 32
D2 = min(4 * DIM, 256)       # hidden width      = 32
B = 2                        # batch
T = 16                       # sequence length
BT = B * T
MEL = 80                     # n_mel_channels
MEL_PAD = 128                # lane-dense mel width (sliced back to MEL)
K = 5                        # conv kernel size
PAD = K // 2
N_BLOCKS = 2
BLOCK_DEPTH = 2
L = N_BLOCKS * BLOCK_DEPTH   # total conv units = 4
EPS = 1e-5

# row layout of the packed per-channel-vector tensor `vec` (NVEC, D2)
ROW_B_PROJ = 0
ROW_G_PROJ = 1
ROW_BE_PROJ = 2
ROW_CONV = 3                      # + 4*li + {0: dw_b, 1: pw_b, 2: c_g, 3: c_b}
ROW_SKIP = ROW_CONV + 4 * L       # + 2*blk + {0: s_g, 1: s_b}
NVEC = ROW_SKIP + 2 * N_BLOCKS    # 23


def _ln(x, g, b):
    # single-pass LayerNorm: one reduction pair (mean, E[x^2]) per call
    mu = jnp.mean(x, axis=-1, keepdims=True)
    var = jnp.mean(x * x, axis=-1, keepdims=True) - mu * mu
    return (x - mu) * jax.lax.rsqrt(var + EPS) * g + b


def mel_decoder_kernel(feat_ref, wproj_ref, dww_ref, pww_ref, vec_ref,
                       wmelb_ref, out_ref):
    vec = vec_ref[...]                                   # (NVEC, D2), loaded once

    def row(i):                                          # (1, D2) broadcast row
        return vec[i:i + 1, :]

    # ---- constant per-batch time-shift matrices (built once, reused 4x) ----
    # S_s[r, c] = 1 iff c == r + s and the shift stays inside the same batch's
    # zero-padded window; tap_s = S_s @ cur gives the shifted rows with zeros
    # at the sequence edges — all in registers / on the MXU, no VMEM scratch.
    r_idx = jax.lax.broadcasted_iota(jnp.int32, (BT, BT), 0)
    c_idx = jax.lax.broadcasted_iota(jnp.int32, (BT, BT), 1)
    t_idx = jax.lax.broadcasted_iota(jnp.int32, (B, T, BT), 1).reshape(BT, BT)

    def shift_mat(s):
        ok = (c_idx == r_idx + s) & (t_idx + s >= 0) & (t_idx + s < T)
        return jnp.where(ok, 1.0, 0.0).astype(jnp.float32)

    smats = {s: shift_mat(s) for s in range(-PAD, PAD + 1) if s != 0}

    # ---- proj: Linear -> Tanh -> LayerNorm ----
    x = feat_ref[...].reshape(BT, D4)
    h = jnp.tanh(jnp.dot(x, wproj_ref[...],
                         preferred_element_type=jnp.float32) + row(ROW_B_PROJ))
    skip = _ln(h, row(ROW_G_PROJ), row(ROW_BE_PROJ))     # (BT, D2)

    li = 0
    for blk in range(N_BLOCKS):
        cur = skip
        for _ in range(BLOCK_DEPTH):
            base = ROW_CONV + 4 * li
            w = dww_ref[li]                              # (K, D2) hoisted once
            # ---- depthwise Conv1d(groups=C, k=5, pad=2): in-register taps ----
            y = cur * w[PAD:PAD + 1, :]                  # center tap
            for k in range(K):
                s = k - PAD
                if s == 0:
                    continue
                tap = jnp.dot(smats[s], cur, preferred_element_type=jnp.float32)
                y = y + tap * w[k:k + 1, :]
            y = y + row(base + 0)                        # depthwise bias
            # ---- pointwise Conv1d(kernel=1) == matmul over channels ----
            y = jnp.tanh(jnp.dot(y, pww_ref[li],
                                 preferred_element_type=jnp.float32)
                         + row(base + 1))
            # ---- per-depth LayerNorm ----
            cur = _ln(y, row(base + 2), row(base + 3))
            li += 1
        # ---- residual + skip LayerNorm ----
        srow = ROW_SKIP + 2 * blk
        skip = _ln(cur + skip, row(srow), row(srow + 1))

    # ---- mel head (lane-dense 128-wide output, bias folded as last row) ----
    mel = (jnp.dot(skip, wmelb_ref[:D2, :], preferred_element_type=jnp.float32)
           + wmelb_ref[D2:D2 + 1, :])
    out_ref[...] = mel.reshape(B, T, MEL_PAD)


def mel_decoder(features, params):
    p = params

    # pack the many tiny per-channel vectors into one (NVEC, D2) tensor
    rows = [p["b_proj"], p["g_proj"], p["be_proj"]]
    for li in range(L):
        rows += [p["dw_b"][li:li + 1], p["pw_b"][li:li + 1],
                 p["c_g"][li:li + 1], p["c_b"][li:li + 1]]
    for blk in range(N_BLOCKS):
        rows += [p["s_g"][blk:blk + 1], p["s_b"][blk:blk + 1]]
    vec = jnp.concatenate(rows, axis=0)                          # (NVEC, D2)

    # lane-dense mel head: pad 80 -> 128 output channels, bias as extra row
    w_mel = jnp.pad(p["w_mel"], ((0, 0), (0, MEL_PAD - MEL)))
    b_mel = jnp.pad(p["b_mel"], ((0, 0), (0, MEL_PAD - MEL)))
    wmelb = jnp.concatenate([w_mel, b_mel], axis=0)              # (D2+1, 128)

    inputs = (features, p["w_proj"], p["dw_w"], p["pw_w"], vec, wmelb)

    def full_spec(a):
        nd = a.ndim
        return pl.BlockSpec(a.shape, lambda i, _nd=nd: (0,) * _nd)

    out = pl.pallas_call(
        mel_decoder_kernel,
        out_shape=jax.ShapeDtypeStruct((B, T, MEL_PAD), jnp.float32),
        grid=(1,),                      # whole batch in one tile: one grid step
        in_specs=[full_spec(a) for a in inputs],
        out_specs=pl.BlockSpec((B, T, MEL_PAD), lambda i: (0, 0, 0)),
        compiler_params=pltpu.CompilerParams(
            dimension_semantics=("arbitrary",)),
    )(*inputs)
    # TODO(synk): on v7x a 2-way "parallel" grid over the B*T rows would use
    # both TensorCores; at this problem size single-step overhead wins.
    return out[:, :, :MEL]


def init_params(key):
    ks = jax.random.split(key, 14)
    r = lambda k, s, sc=0.1: sc * jax.random.normal(k, s, jnp.float32)
    return {
        "w_proj": r(ks[0], (D4, D2)),
        "b_proj": r(ks[1], (1, D2)),
        "g_proj": 1.0 + r(ks[2], (1, D2)),
        "be_proj": r(ks[3], (1, D2)),
        "dw_w": r(ks[4], (L, K, D2)),       # torch weight[c,0,k] -> [l, k, c]
        "dw_b": r(ks[5], (L, D2)),
        "pw_w": r(ks[6], (L, D2, D2)),      # torch weight[o,i,0].T -> [l, i, o]
        "pw_b": r(ks[7], (L, D2)),
        "c_g": 1.0 + r(ks[8], (L, D2)),
        "c_b": r(ks[9], (L, D2)),
        "s_g": 1.0 + r(ks[10], (N_BLOCKS, D2)),
        "s_b": r(ks[11], (N_BLOCKS, D2)),
        "w_mel": r(ks[12], (D2, MEL)),
        "b_mel": r(ks[13], (1, MEL)),
    }


def _layernorm_ref(x, g, b):
    mu = jnp.mean(x, axis=-1, keepdims=True)
    var = jnp.mean((x - mu) ** 2, axis=-1, keepdims=True)
    return (x - mu) * jax.lax.rsqrt(var + EPS) * g + b


def reference(features, p):
    """Pure-JAX reference mirroring the PyTorch forward exactly."""
    skip = _layernorm_ref(jnp.tanh(features @ p["w_proj"] + p["b_proj"]),
                          p["g_proj"], p["be_proj"])
    li = 0
    for blk in range(N_BLOCKS):
        x = skip
        for _ in range(BLOCK_DEPTH):
            xp = jnp.pad(x, ((0, 0), (PAD, PAD), (0, 0)))
            y = sum(xp[:, k:k + T, :] * p["dw_w"][li, k] for k in range(K))
            y = y + p["dw_b"][li]
            y = jnp.tanh(y @ p["pw_w"][li] + p["pw_b"][li])
            x = _layernorm_ref(y, p["c_g"][li], p["c_b"][li])
            li += 1
        skip = _layernorm_ref(x + skip, p["s_g"][blk], p["s_b"][blk])
    return skip @ p["w_mel"] + p["b_mel"]


if __name__ == "__main__":
    key = jax.random.PRNGKey(0)
    k_feat, k_par = jax.random.split(key)
    features = jax.random.normal(k_feat, (B, T, D4), jnp.float32)
    params = init_params(k_par)

    mel = jax.block_until_ready(mel_decoder(features, params))
    ref = jax.block_until_ready(reference(features, params))

    assert mel.shape == (B, T, MEL), mel.shape
    np.testing.assert_allclose(np.asarray(mel), np.asarray(ref),
                               rtol=2e-3, atol=2e-3)
    print("KERNEL_OK")
</pallas_src>

<mosaic_0001>
module attributes {stable_mosaic.version = 11 : i64} {
  func.func @mel_decoder_kernel(%arg0: i32, %arg1: memref<2x16x32xf32, #tpu.memory_space<vmem>>, %arg2: memref<32x32xf32, #tpu.memory_space<vmem>>, %arg3: memref<4x5x32xf32, #tpu.memory_space<vmem>>, %arg4: memref<4x32x32xf32, #tpu.memory_space<vmem>>, %arg5: memref<23x32xf32, #tpu.memory_space<vmem>>, %arg6: memref<33x128xf32, #tpu.memory_space<vmem>>, %arg7: memref<2x16x128xf32, #tpu.memory_space<vmem>>) attributes {dimension_semantics = [#tpu.dimension_semantics<arbitrary>], iteration_bounds = array<i64: 1>, scalar_prefetch = 0 : i64, scratch_operands = 0 : i64, tpu.core_type = #tpu.core_type<tc>, window_params = [{pipeline_mode = #tpu.pipeline_mode<synchronous>, transform_indices = @transform_0, window_bounds = array<i64: 2, 16, 32>}, {pipeline_mode = #tpu.pipeline_mode<synchronous>, transform_indices = @transform_1, window_bounds = array<i64: 32, 32>}, {pipeline_mode = #tpu.pipeline_mode<synchronous>, transform_indices = @transform_2, window_bounds = array<i64: 4, 5, 32>}, {pipeline_mode = #tpu.pipeline_mode<synchronous>, transform_indices = @transform_3, window_bounds = array<i64: 4, 32, 32>}, {pipeline_mode = #tpu.pipeline_mode<synchronous>, transform_indices = @transform_4, window_bounds = array<i64: 23, 32>}, {pipeline_mode = #tpu.pipeline_mode<synchronous>, transform_indices = @transform_5, window_bounds = array<i64: 33, 128>}, {pipeline_mode = #tpu.pipeline_mode<synchronous>, transform_indices = @transform_6, window_bounds = array<i64: 2, 16, 128>}]} {
    %c0 = arith.constant 0 : index
    %c0_0 = arith.constant 0 : index
    %0 = vector.load %arg5[%c0, %c0_0] : memref<23x32xf32, #tpu.memory_space<vmem>>, vector<23x32xf32>
    %1 = tpu.iota {dimensions = array<i32: 0>} : vector<32x32xi32>
    %2 = tpu.iota {dimensions = array<i32: 1>} : vector<32x32xi32>
    %3 = tpu.iota {dimensions = array<i32: 1>} : vector<2x16x32xi32>
    %4 = vector.shape_cast %3 : vector<2x16x32xi32> to vector<32x32xi32>
    %c-2_i32 = arith.constant -2 : i32
    %5 = vector.broadcast %c-2_i32 : i32 to vector<32x32xi32>
    %6 = arith.addi %1, %5 : vector<32x32xi32>
    %7 = arith.cmpi eq, %2, %6 : vector<32x32xi32>
    %c-2_i32_1 = arith.constant -2 : i32
    %8 = vector.broadcast %c-2_i32_1 : i32 to vector<32x32xi32>
    %9 = arith.addi %4, %8 : vector<32x32xi32>
    %c0_i32 = arith.constant 0 : i32
    %10 = vector.broadcast %c0_i32 : i32 to vector<32x32xi32>
    %11 = arith.cmpi sge, %9, %10 : vector<32x32xi32>
    %12 = arith.andi %7, %11 : vector<32x32xi1>
    %c-2_i32_2 = arith.constant -2 : i32
    %13 = vector.broadcast %c-2_i32_2 : i32 to vector<32x32xi32>
    %14 = arith.addi %4, %13 : vector<32x32xi32>
    %c16_i32 = arith.constant 16 : i32
    %15 = vector.broadcast %c16_i32 : i32 to vector<32x32xi32>
    %16 = arith.cmpi slt, %14, %15 : vector<32x32xi32>
    %17 = arith.andi %12, %16 : vector<32x32xi1>
    %cst = arith.constant 1.000000e+00 : f32
    %cst_3 = arith.constant 0.000000e+00 : f32
    %18 = vector.broadcast %cst : f32 to vector<32x32xf32>
    %19 = vector.broadcast %cst_3 : f32 to vector<32x32xf32>
    %20 = arith.select %17, %18, %19 : vector<32x32xi1>, vector<32x32xf32>
    %c-1_i32 = arith.constant -1 : i32
    %21 = vector.broadcast %c-1_i32 : i32 to vector<32x32xi32>
    %22 = arith.addi %1, %21 : vector<32x32xi32>
    %23 = arith.cmpi eq, %2, %22 : vector<32x32xi32>
    %c-1_i32_4 = arith.constant -1 : i32
    %24 = vector.broadcast %c-1_i32_4 : i32 to vector<32x32xi32>
    %25 = arith.addi %4, %24 : vector<32x32xi32>
    %c0_i32_5 = arith.constant 0 : i32
    %26 = vector.broadcast %c0_i32_5 : i32 to vector<32x32xi32>
    %27 = arith.cmpi sge, %25, %26 : vector<32x32xi32>
    %28 = arith.andi %23, %27 : vector<32x32xi1>
    %c-1_i32_6 = arith.constant -1 : i32
    %29 = vector.broadcast %c-1_i32_6 : i32 to vector<32x32xi32>
    %30 = arith.addi %4, %29 : vector<32x32xi32>
    %c16_i32_7 = arith.constant 16 : i32
    %31 = vector.broadcast %c16_i32_7 : i32 to vector<32x32xi32>
    %32 = arith.cmpi slt, %30, %31 : vector<32x32xi32>
    %33 = arith.andi %28, %32 : vector<32x32xi1>
    %cst_8 = arith.constant 1.000000e+00 : f32
    %cst_9 = arith.constant 0.000000e+00 : f32
    %34 = vector.broadcast %cst_8 : f32 to vector<32x32xf32>
    %35 = vector.broadcast %cst_9 : f32 to vector<32x32xf32>
    %36 = arith.select %33, %34, %35 : vector<32x32xi1>, vector<32x32xf32>
    %c1_i32 = arith.constant 1 : i32
    %37 = vector.broadcast %c1_i32 : i32 to vector<32x32xi32>
    %38 = arith.addi %1, %37 : vector<32x32xi32>
    %39 = arith.cmpi eq, %2, %38 : vector<32x32xi32>
    %c1_i32_10 = arith.constant 1 : i32
    %40 = vector.broadcast %c1_i32_10 : i32 to vector<32x32xi32>
    %41 = arith.addi %4, %40 : vector<32x32xi32>
    %c0_i32_11 = arith.constant 0 : i32
    %42 = vector.broadcast %c0_i32_11 : i32 to vector<32x32xi32>
    %43 = arith.cmpi sge, %41, %42 : vector<32x32xi32>
    %44 = arith.andi %39, %43 : vector<32x32xi1>
    %c1_i32_12 = arith.constant 1 : i32
    %45 = vector.broadcast %c1_i32_12 : i32 to vector<32x32xi32>
    %46 = arith.addi %4, %45 : vector<32x32xi32>
    %c16_i32_13 = arith.constant 16 : i32
    %47 = vector.broadcast %c16_i32_13 : i32 to vector<32x32xi32>
    %48 = arith.cmpi slt, %46, %47 : vector<32x32xi32>
    %49 = arith.andi %44, %48 : vector<32x32xi1>
    %cst_14 = arith.constant 1.000000e+00 : f32
    %cst_15 = arith.constant 0.000000e+00 : f32
    %50 = vector.broadcast %cst_14 : f32 to vector<32x32xf32>
    %51 = vector.broadcast %cst_15 : f32 to vector<32x32xf32>
    %52 = arith.select %49, %50, %51 : vector<32x32xi1>, vector<32x32xf32>
    %c2_i32 = arith.constant 2 : i32
    %53 = vector.broadcast %c2_i32 : i32 to vector<32x32xi32>
    %54 = arith.addi %1, %53 : vector<32x32xi32>
    %55 = arith.cmpi eq, %2, %54 : vector<32x32xi32>
    %c2_i32_16 = arith.constant 2 : i32
    %56 = vector.broadcast %c2_i32_16 : i32 to vector<32x32xi32>
    %57 = arith.addi %4, %56 : vector<32x32xi32>
    %c0_i32_17 = arith.constant 0 : i32
    %58 = vector.broadcast %c0_i32_17 : i32 to vector<32x32xi32>
    %59 = arith.cmpi sge, %57, %58 : vector<32x32xi32>
    %60 = arith.andi %55, %59 : vector<32x32xi1>
    %c2_i32_18 = arith.constant 2 : i32
    %61 = vector.broadcast %c2_i32_18 : i32 to vector<32x32xi32>
    %62 = arith.addi %4, %61 : vector<32x32xi32>
    %c16_i32_19 = arith.constant 16 : i32
    %63 = vector.broadcast %c16_i32_19 : i32 to vector<32x32xi32>
    %64 = arith.cmpi slt, %62, %63 : vector<32x32xi32>
    %65 = arith.andi %60, %64 : vector<32x32xi1>
    %cst_20 = arith.constant 1.000000e+00 : f32
    %cst_21 = arith.constant 0.000000e+00 : f32
    %66 = vector.broadcast %cst_20 : f32 to vector<32x32xf32>
    %67 = vector.broadcast %cst_21 : f32 to vector<32x32xf32>
    %68 = arith.select %65, %66, %67 : vector<32x32xi1>, vector<32x32xf32>
    %c0_22 = arith.constant 0 : index
    %c0_23 = arith.constant 0 : index
    %c0_24 = arith.constant 0 : index
    %69 = vector.load %arg1[%c0_22, %c0_23, %c0_24] : memref<2x16x32xf32, #tpu.memory_space<vmem>>, vector<2x16x32xf32>
    %70 = vector.shape_cast %69 : vector<2x16x32xf32> to vector<32x32xf32>
    %c0_25 = arith.constant 0 : index
    %c0_26 = arith.constant 0 : index
    %71 = vector.load %arg2[%c0_25, %c0_26] : memref<32x32xf32, #tpu.memory_space<vmem>>, vector<32x32xf32>
    %cst_27 = arith.constant dense<0.000000e+00> : vector<32x32xf32>
    %72 = tpu.matmul %70, %71, %cst_27 {dimension_numbers = #tpu.dot_dimension_numbers<[1], [0], [0], [1], [0, 0, 1, 1], [], []>} : vector<32x32xf32>, vector<32x32xf32>, vector<32x32xf32> -> vector<32x32xf32>
    %73 = vector.extract_strided_slice %0 {offsets = [0, 0], sizes = [1, 32], strides = [1, 1]} : vector<23x32xf32> to vector<1x32xf32>
    %74 = vector.broadcast %73 : vector<1x32xf32> to vector<32x32xf32>
    %75 = arith.addf %72, %74 : vector<32x32xf32>
    %76 = math.tanh %75 : vector<32x32xf32>
    %77 = vector.extract_strided_slice %0 {offsets = [1, 0], sizes = [1, 32], strides = [1, 1]} : vector<23x32xf32> to vector<1x32xf32>
    %78 = vector.extract_strided_slice %0 {offsets = [2, 0], sizes = [1, 32], strides = [1, 1]} : vector<23x32xf32> to vector<1x32xf32>
    %cst_28 = arith.constant dense<0.000000e+00> : vector<32xf32>
    %79 = vector.multi_reduction <add>, %76, %cst_28 [1] : vector<32x32xf32> to vector<32xf32>
    %80 = vector.shape_cast %79 : vector<32xf32> to vector<32x1xf32>
    %cst_29 = arith.constant 3.200000e+01 : f32
    %81 = vector.broadcast %cst_29 : f32 to vector<32x1xf32>
    %82 = arith.divf %80, %81 : vector<32x1xf32>
    %83 = arith.mulf %76, %76 : vector<32x32xf32>
    %cst_30 = arith.constant dense<0.000000e+00> : vector<32xf32>
    %84 = vector.multi_reduction <add>, %83, %cst_30 [1] : vector<32x32xf32> to vector<32xf32>
    %85 = vector.shape_cast %84 : vector<32xf32> to vector<32x1xf32>
    %cst_31 = arith.constant 3.200000e+01 : f32
    %86 = vector.broadcast %cst_31 : f32 to vector<32x1xf32>
    %87 = arith.divf %85, %86 : vector<32x1xf32>
    %88 = arith.mulf %82, %82 : vector<32x1xf32>
    %89 = arith.subf %87, %88 : vector<32x1xf32>
    %90 = vector.broadcast %82 : vector<32x1xf32> to vector<32x32xf32>
    %91 = arith.subf %76, %90 : vector<32x32xf32>
    %cst_32 = arith.constant 9.99999974E-6 : f32
    %92 = vector.broadcast %cst_32 : f32 to vector<32x1xf32>
    %93 = arith.addf %89, %92 : vector<32x1xf32>
    %94 = math.rsqrt %93 : vector<32x1xf32>
    %95 = vector.broadcast %94 : vector<32x1xf32> to vector<32x32xf32>
    %96 = arith.mulf %91, %95 : vector<32x32xf32>
    %97 = vector.broadcast %77 : vector<1x32xf32> to vector<32x32xf32>
    %98 = arith.mulf %96, %97 : vector<32x32xf32>
    %99 = vector.broadcast %78 : vector<1x32xf32> to vector<32x32xf32>
    %100 = arith.addf %98, %99 : vector<32x32xf32>
    %c0_33 = arith.constant 0 : index
    %c0_34 = arith.constant 0 : index
    %c0_35 = arith.constant 0 : index
    %101 = vector.load %arg3[%c0_33, %c0_34, %c0_35] : memref<4x5x32xf32, #tpu.memory_space<vmem>>, vector<1x5x32xf32>
    %102 = vector.shape_cast %101 : vector<1x5x32xf32> to vector<5x32xf32>
    %103 = vector.extract_strided_slice %102 {offsets = [2, 0], sizes = [1, 32], strides = [1, 1]} : vector<5x32xf32> to vector<1x32xf32>
    %104 = vector.broadcast %103 : vector<1x32xf32> to vector<32x32xf32>
    %105 = arith.mulf %100, %104 : vector<32x32xf32>
    %cst_36 = arith.constant dense<0.000000e+00> : vector<32x32xf32>
    %106 = tpu.matmul %20, %100, %cst_36 {dimension_numbers = #tpu.dot_dimension_numbers<[1], [0], [0], [1], [0, 0, 1, 1], [], []>} : vector<32x32xf32>, vector<32x32xf32>, vector<32x32xf32> -> vector<32x32xf32>
    %107 = vector.extract_strided_slice %102 {offsets = [0, 0], sizes = [1, 32], strides = [1, 1]} : vector<5x32xf32> to vector<1x32xf32>
    %108 = vector.broadcast %107 : vector<1x32xf32> to vector<32x32xf32>
    %109 = arith.mulf %106, %108 : vector<32x32xf32>
    %110 = arith.addf %105, %109 : vector<32x32xf32>
    %cst_37 = arith.constant dense<0.000000e+00> : vector<32x32xf32>
    %111 = tpu.matmul %36, %100, %cst_37 {dimension_numbers = #tpu.dot_dimension_numbers<[1], [0], [0], [1], [0, 0, 1, 1], [], []>} : vector<32x32xf32>, vector<32x32xf32>, vector<32x32xf32> -> vector<32x32xf32>
    %112 = vector.extract_strided_slice %102 {offsets = [1, 0], sizes = [1, 32], strides = [1, 1]} : vector<5x32xf32> to vector<1x32xf32>
    %113 = vector.broadcast %112 : vector<1x32xf32> to vector<32x32xf32>
    %114 = arith.mulf %111, %113 : vector<32x32xf32>
    %115 = arith.addf %110, %114 : vector<32x32xf32>
    %cst_38 = arith.constant dense<0.000000e+00> : vector<32x32xf32>
    %116 = tpu.matmul %52, %100, %cst_38 {dimension_numbers = #tpu.dot_dimension_numbers<[1], [0], [0], [1], [0, 0, 1, 1], [], []>} : vector<32x32xf32>, vector<32x32xf32>, vector<32x32xf32> -> vector<32x32xf32>
    %117 = vector.extract_strided_slice %102 {offsets = [3, 0], sizes = [1, 32], strides = [1, 1]} : vector<5x32xf32> to vector<1x32xf32>
    %118 = vector.broadcast %117 : vector<1x32xf32> to vector<32x32xf32>
    %119 = arith.mulf %116, %118 : vector<32x32xf32>
    %120 = arith.addf %115, %119 : vector<32x32xf32>
    %cst_39 = arith.constant dense<0.000000e+00> : vector<32x32xf32>
    %121 = tpu.matmul %68, %100, %cst_39 {dimension_numbers = #tpu.dot_dimension_numbers<[1], [0], [0], [1], [0, 0, 1, 1], [], []>} : vector<32x32xf32>, vector<32x32xf32>, vector<32x32xf32> -> vector<32x32xf32>
    %122 = vector.extract_strided_slice %102 {offsets = [4, 0], sizes = [1, 32], strides = [1, 1]} : vector<5x32xf32> to vector<1x32xf32>
    %123 = vector.broadcast %122 : vector<1x32xf32> to vector<32x32xf32>
    %124 = arith.mulf %121, %123 : vector<32x32xf32>
    %125 = arith.addf %120, %124 : vector<32x32xf32>
    %126 = vector.extract_strided_slice %0 {offsets = [3, 0], sizes = [1, 32], strides = [1, 1]} : vector<23x32xf32> to vector<1x32xf32>
    %127 = vector.broadcast %126 : vector<1x32xf32> to vector<32x32xf32>
    %128 = arith.addf %125, %127 : vector<32x32xf32>
    %c0_40 = arith.constant 0 : index
    %c0_41 = arith.constant 0 : index
    %c0_42 = arith.constant 0 : index
    %129 = vector.load %arg4[%c0_40, %c0_41, %c0_42] : memref<4x32x32xf32, #tpu.memory_space<vmem>>, vector<1x32x32xf32>
    %130 = vector.shape_cast %129 : vector<1x32x32xf32> to vector<32x32xf32>
    %cst_43 = arith.constant dense<0.000000e+00> : vector<32x32xf32>
    %131 = tpu.matmul %128, %130, %cst_43 {dimension_numbers = #tpu.dot_dimension_numbers<[1], [0], [0], [1], [0, 0, 1, 1], [], []>} : vector<32x32xf32>, vector<32x32xf32>, vector<32x32xf32> -> vector<32x32xf32>
    %132 = vector.extract_strided_slice %0 {offsets = [4, 0], sizes = [1, 32], strides = [1, 1]} : vector<23x32xf32> to vector<1x32xf32>
    %133 = vector.broadcast %132 : vector<1x32xf32> to vector<32x32xf32>
    %134 = arith.addf %131, %133 : vector<32x32xf32>
    %135 = math.tanh %134 : vector<32x32xf32>
    %136 = vector.extract_strided_slice %0 {offsets = [5, 0], sizes = [1, 32], strides = [1, 1]} : vector<23x32xf32> to vector<1x32xf32>
    %137 = vector.extract_strided_slice %0 {offsets = [6, 0], sizes = [1, 32], strides = [1, 1]} : vector<23x32xf32> to vector<1x32xf32>
    %cst_44 = arith.constant dense<0.000000e+00> : vector<32xf32>
    %138 = vector.multi_reduction <add>, %135, %cst_44 [1] : vector<32x32xf32> to vector<32xf32>
    %139 = vector.shape_cast %138 : vector<32xf32> to vector<32x1xf32>
    %cst_45 = arith.constant 3.200000e+01 : f32
    %140 = vector.broadcast %cst_45 : f32 to vector<32x1xf32>
    %141 = arith.divf %139, %140 : vector<32x1xf32>
    %142 = arith.mulf %135, %135 : vector<32x32xf32>
    %cst_46 = arith.constant dense<0.000000e+00> : vector<32xf32>
    %143 = vector.multi_reduction <add>, %142, %cst_46 [1] : vector<32x32xf32> to vector<32xf32>
    %144 = vector.shape_cast %143 : vector<32xf32> to vector<32x1xf32>
    %cst_47 = arith.constant 3.200000e+01 : f32
    %145 = vector.broadcast %cst_47 : f32 to vector<32x1xf32>
    %146 = arith.divf %144, %145 : vector<32x1xf32>
    %147 = arith.mulf %141, %141 : vector<32x1xf32>
    %148 = arith.subf %146, %147 : vector<32x1xf32>
    %149 = vector.broadcast %141 : vector<32x1xf32> to vector<32x32xf32>
    %150 = arith.subf %135, %149 : vector<32x32xf32>
    %cst_48 = arith.constant 9.99999974E-6 : f32
    %151 = vector.broadcast %cst_48 : f32 to vector<32x1xf32>
    %152 = arith.addf %148, %151 : vector<32x1xf32>
    %153 = math.rsqrt %152 : vector<32x1xf32>
    %154 = vector.broadcast %153 : vector<32x1xf32> to vector<32x32xf32>
    %155 = arith.mulf %150, %154 : vector<32x32xf32>
    %156 = vector.broadcast %136 : vector<1x32xf32> to vector<32x32xf32>
    %157 = arith.mulf %155, %156 : vector<32x32xf32>
    %158 = vector.broadcast %137 : vector<1x32xf32> to vector<32x32xf32>
    %159 = arith.addf %157, %158 : vector<32x32xf32>
    %c1 = arith.constant 1 : index
    %c0_49 = arith.constant 0 : index
    %c0_50 = arith.constant 0 : index
    %160 = vector.load %arg3[%c1, %c0_49, %c0_50] : memref<4x5x32xf32, #tpu.memory_space<vmem>>, vector<1x5x32xf32>
    %161 = vector.shape_cast %160 : vector<1x5x32xf32> to vector<5x32xf32>
    %162 = vector.extract_strided_slice %161 {offsets = [2, 0], sizes = [1, 32], strides = [1, 1]} : vector<5x32xf32> to vector<1x32xf32>
    %163 = vector.broadcast %162 : vector<1x32xf32> to vector<32x32xf32>
    %164 = arith.mulf %159, %163 : vector<32x32xf32>
    %cst_51 = arith.constant dense<0.000000e+00> : vector<32x32xf32>
    %165 = tpu.matmul %20, %159, %cst_51 {dimension_numbers = #tpu.dot_dimension_numbers<[1], [0], [0], [1], [0, 0, 1, 1], [], []>} : vector<32x32xf32>, vector<32x32xf32>, vector<32x32xf32> -> vector<32x32xf32>
    %166 = vector.extract_strided_slice %161 {offsets = [0, 0], sizes = [1, 32], strides = [1, 1]} : vector<5x32xf32> to vector<1x32xf32>
    %167 = vector.broadcast %166 : vector<1x32xf32> to vector<32x32xf32>
    %168 = arith.mulf %165, %167 : vector<32x32xf32>
    %169 = arith.addf %164, %168 : vector<32x32xf32>
    %cst_52 = arith.constant dense<0.000000e+00> : vector<32x32xf32>
    %170 = tpu.matmul %36, %159, %cst_52 {dimension_numbers = #tpu.dot_dimension_numbers<[1], [0], [0], [1], [0, 0, 1, 1], [], []>} : vector<32x32xf32>, vector<32x32xf32>, vector<32x32xf32> -> vector<32x32xf32>
    %171 = vector.extract_strided_slice %161 {offsets = [1, 0], sizes = [1, 32], strides = [1, 1]} : vector<5x32xf32> to vector<1x32xf32>
    %172 = vector.broadcast %171 : vector<1x32xf32> to vector<32x32xf32>
    %173 = arith.mulf %170, %172 : vector<32x32xf32>
    %174 = arith.addf %169, %173 : vector<32x32xf32>
    %cst_53 = arith.constant dense<0.000000e+00> : vector<32x32xf32>
    %175 = tpu.matmul %52, %159, %cst_53 {dimension_numbers = #tpu.dot_dimension_numbers<[1], [0], [0], [1], [0, 0, 1, 1], [], []>} : vector<32x32xf32>, vector<32x32xf32>, vector<32x32xf32> -> vector<32x32xf32>
    %176 = vector.extract_strided_slice %161 {offsets = [3, 0], sizes = [1, 32], strides = [1, 1]} : vector<5x32xf32> to vector<1x32xf32>
    %177 = vector.broadcast %176 : vector<1x32xf32> to vector<32x32xf32>
    %178 = arith.mulf %175, %177 : vector<32x32xf32>
    %179 = arith.addf %174, %178 : vector<32x32xf32>
    %cst_54 = arith.constant dense<0.000000e+00> : vector<32x32xf32>
    %180 = tpu.matmul %68, %159, %cst_54 {dimension_numbers = #tpu.dot_dimension_numbers<[1], [0], [0], [1], [0, 0, 1, 1], [], []>} : vector<32x32xf32>, vector<32x32xf32>, vector<32x32xf32> -> vector<32x32xf32>
    %181 = vector.extract_strided_slice %161 {offsets = [4, 0], sizes = [1, 32], strides = [1, 1]} : vector<5x32xf32> to vector<1x32xf32>
    %182 = vector.broadcast %181 : vector<1x32xf32> to vector<32x32xf32>
    %183 = arith.mulf %180, %182 : vector<32x32xf32>
    %184 = arith.addf %179, %183 : vector<32x32xf32>
    %185 = vector.extract_strided_slice %0 {offsets = [7, 0], sizes = [1, 32], strides = [1, 1]} : vector<23x32xf32> to vector<1x32xf32>
    %186 = vector.broadcast %185 : vector<1x32xf32> to vector<32x32xf32>
    %187 = arith.addf %184, %186 : vector<32x32xf32>
    %c1_55 = arith.constant 1 : index
    %c0_56 = arith.constant 0 : index
    %c0_57 = arith.constant 0 : index
    %188 = vector.load %arg4[%c1_55, %c0_56, %c0_57] : memref<4x32x32xf32, #tpu.memory_space<vmem>>, vector<1x32x32xf32>
    %189 = vector.shape_cast %188 : vector<1x32x32xf32> to vector<32x32xf32>
    %cst_58 = arith.constant dense<0.000000e+00> : vector<32x32xf32>
    %190 = tpu.matmul %187, %189, %cst_58 {dimension_numbers = #tpu.dot_dimension_numbers<[1], [0], [0], [1], [0, 0, 1, 1], [], []>} : vector<32x32xf32>, vector<32x32xf32>, vector<32x32xf32> -> vector<32x32xf32>
    %191 = vector.extract_strided_slice %0 {offsets = [8, 0], sizes = [1, 32], strides = [1, 1]} : vector<23x32xf32> to vector<1x32xf32>
    %192 = vector.broadcast %191 : vector<1x32xf32> to vector<32x32xf32>
    %193 = arith.addf %190, %192 : vector<32x32xf32>
    %194 = math.tanh %193 : vector<32x32xf32>
    %195 = vector.extract_strided_slice %0 {offsets = [9, 0], sizes = [1, 32], strides = [1, 1]} : vector<23x32xf32> to vector<1x32xf32>
    %196 = vector.extract_strided_slice %0 {offsets = [10, 0], sizes = [1, 32], strides = [1, 1]} : vector<23x32xf32> to vector<1x32xf32>
    %cst_59 = arith.constant dense<0.000000e+00> : vector<32xf32>
    %197 = vector.multi_reduction <add>, %194, %cst_59 [1] : vector<32x32xf32> to vector<32xf32>
    %198 = vector.shape_cast %197 : vector<32xf32> to vector<32x1xf32>
    %cst_60 = arith.constant 3.200000e+01 : f32
    %199 = vector.broadcast %cst_60 : f32 to vector<32x1xf32>
    %200 = arith.divf %198, %199 : vector<32x1xf32>
    %201 = arith.mulf %194, %194 : vector<32x32xf32>
    %cst_61 = arith.constant dense<0.000000e+00> : vector<32xf32>
    %202 = vector.multi_reduction <add>, %201, %cst_61 [1] : vector<32x32xf32> to vector<32xf32>
    %203 = vector.shape_cast %202 : vector<32xf32> to vector<32x1xf32>
    %cst_62 = arith.constant 3.200000e+01 : f32
    %204 = vector.broadcast %cst_62 : f32 to vector<32x1xf32>
    %205 = arith.divf %203, %204 : vector<32x1xf32>
    %206 = arith.mulf %200, %200 : vector<32x1xf32>
    %207 = arith.subf %205, %206 : vector<32x1xf32>
    %208 = vector.broadcast %200 : vector<32x1xf32> to vector<32x32xf32>
    %209 = arith.subf %194, %208 : vector<32x32xf32>
    %cst_63 = arith.constant 9.99999974E-6 : f32
    %210 = vector.broadcast %cst_63 : f32 to vector<32x1xf32>
    %211 = arith.addf %207, %210 : vector<32x1xf32>
    %212 = math.rsqrt %211 : vector<32x1xf32>
    %213 = vector.broadcast %212 : vector<32x1xf32> to vector<32x32xf32>
    %214 = arith.mulf %209, %213 : vector<32x32xf32>
    %215 = vector.broadcast %195 : vector<1x32xf32> to vector<32x32xf32>
    %216 = arith.mulf %214, %215 : vector<32x32xf32>
    %217 = vector.broadcast %196 : vector<1x32xf32> to vector<32x32xf32>
    %218 = arith.addf %216, %217 : vector<32x32xf32>
    %219 = arith.addf %218, %100 : vector<32x32xf32>
    %220 = vector.extract_strided_slice %0 {offsets = [19, 0], sizes = [1, 32], strides = [1, 1]} : vector<23x32xf32> to vector<1x32xf32>
    %221 = vector.extract_strided_slice %0 {offsets = [20, 0], sizes = [1, 32], strides = [1, 1]} : vector<23x32xf32> to vector<1x32xf32>
    %cst_64 = arith.constant dense<0.000000e+00> : vector<32xf32>
    %222 = vector.multi_reduction <add>, %219, %cst_64 [1] : vector<32x32xf32> to vector<32xf32>
    %223 = vector.shape_cast %222 : vector<32xf32> to vector<32x1xf32>
    %cst_65 = arith.constant 3.200000e+01 : f32
    %224 = vector.broadcast %cst_65 : f32 to vector<32x1xf32>
    %225 = arith.divf %223, %224 : vector<32x1xf32>
    %226 = arith.mulf %219, %219 : vector<32x32xf32>
    %cst_66 = arith.constant dense<0.000000e+00> : vector<32xf32>
    %227 = vector.multi_reduction <add>, %226, %cst_66 [1] : vector<32x32xf32> to vector<32xf32>
    %228 = vector.shape_cast %227 : vector<32xf32> to vector<32x1xf32>
    %cst_67 = arith.constant 3.200000e+01 : f32
    %229 = vector.broadcast %cst_67 : f32 to vector<32x1xf32>
    %230 = arith.divf %228, %229 : vector<32x1xf32>
    %231 = arith.mulf %225, %225 : vector<32x1xf32>
    %232 = arith.subf %230, %231 : vector<32x1xf32>
    %233 = vector.broadcast %225 : vector<32x1xf32> to vector<32x32xf32>
    %234 = arith.subf %219, %233 : vector<32x32xf32>
    %cst_68 = arith.constant 9.99999974E-6 : f32
    %235 = vector.broadcast %cst_68 : f32 to vector<32x1xf32>
    %236 = arith.addf %232, %235 : vector<32x1xf32>
    %237 = math.rsqrt %236 : vector<32x1xf32>
    %238 = vector.broadcast %237 : vector<32x1xf32> to vector<32x32xf32>
    %239 = arith.mulf %234, %238 : vector<32x32xf32>
    %240 = vector.broadcast %220 : vector<1x32xf32> to vector<32x32xf32>
    %241 = arith.mulf %239, %240 : vector<32x32xf32>
    %242 = vector.broadcast %221 : vector<1x32xf32> to vector<32x32xf32>
    %243 = arith.addf %241, %242 : vector<32x32xf32>
    %c2 = arith.constant 2 : index
    %c0_69 = arith.constant 0 : index
    %c0_70 = arith.constant 0 : index
    %244 = vector.load %arg3[%c2, %c0_69, %c0_70] : memref<4x5x32xf32, #tpu.memory_space<vmem>>, vector<1x5x32xf32>
    %245 = vector.shape_cast %244 : vector<1x5x32xf32> to vector<5x32xf32>
    %246 = vector.extract_strided_slice %245 {offsets = [2, 0], sizes = [1, 32], strides = [1, 1]} : vector<5x32xf32> to vector<1x32xf32>
    %247 = vector.broadcast %246 : vector<1x32xf32> to vector<32x32xf32>
    %248 = arith.mulf %243, %247 : vector<32x32xf32>
    %cst_71 = arith.constant dense<0.000000e+00> : vector<32x32xf32>
    %249 = tpu.matmul %20, %243, %cst_71 {dimension_numbers = #tpu.dot_dimension_numbers<[1], [0], [0], [1], [0, 0, 1, 1], [], []>} : vector<32x32xf32>, vector<32x32xf32>, vector<32x32xf32> -> vector<32x32xf32>
    %250 = vector.extract_strided_slice %245 {offsets = [0, 0], sizes = [1, 32], strides = [1, 1]} : vector<5x32xf32> to vector<1x32xf32>
    %251 = vector.broadcast %250 : vector<1x32xf32> to vector<32x32xf32>
    %252 = arith.mulf %249, %251 : vector<32x32xf32>
    %253 = arith.addf %248, %252 : vector<32x32xf32>
    %cst_72 = arith.constant dense<0.000000e+00> : vector<32x32xf32>
    %254 = tpu.matmul %36, %243, %cst_72 {dimension_numbers = #tpu.dot_dimension_numbers<[1], [0], [0], [1], [0, 0, 1, 1], [], []>} : vector<32x32xf32>, vector<32x32xf32>, vector<32x32xf32> -> vector<32x32xf32>
    %255 = vector.extract_strided_slice %245 {offsets = [1, 0], sizes = [1, 32], strides = [1, 1]} : vector<5x32xf32> to vector<1x32xf32>
    %256 = vector.broadcast %255 : vector<1x32xf32> to vector<32x32xf32>
    %257 = arith.mulf %254, %256 : vector<32x32xf32>
    %258 = arith.addf %253, %257 : vector<32x32xf32>
    %cst_73 = arith.constant dense<0.000000e+00> : vector<32x32xf32>
    %259 = tpu.matmul %52, %243, %cst_73 {dimension_numbers = #tpu.dot_dimension_numbers<[1], [0], [0], [1], [0, 0, 1, 1], [], []>} : vector<32x32xf32>, vector<32x32xf32>, vector<32x32xf32> -> vector<32x32xf32>
    %260 = vector.extract_strided_slice %245 {offsets = [3, 0], sizes = [1, 32], strides = [1, 1]} : vector<5x32xf32> to vector<1x32xf32>
    %261 = vector.broadcast %260 : vector<1x32xf32> to vector<32x32xf32>
    %262 = arith.mulf %259, %261 : vector<32x32xf32>
    %263 = arith.addf %258, %262 : vector<32x32xf32>
    %cst_74 = arith.constant dense<0.000000e+00> : vector<32x32xf32>
    %264 = tpu.matmul %68, %243, %cst_74 {dimension_numbers = #tpu.dot_dimension_numbers<[1], [0], [0], [1], [0, 0, 1, 1], [], []>} : vector<32x32xf32>, vector<32x32xf32>, vector<32x32xf32> -> vector<32x32xf32>
    %265 = vector.extract_strided_slice %245 {offsets = [4, 0], sizes = [1, 32], strides = [1, 1]} : vector<5x32xf32> to vector<1x32xf32>
    %266 = vector.broadcast %265 : vector<1x32xf32> to vector<32x32xf32>
    %267 = arith.mulf %264, %266 : vector<32x32xf32>
    %268 = arith.addf %263, %267 : vector<32x32xf32>
    %269 = vector.extract_strided_slice %0 {offsets = [11, 0], sizes = [1, 32], strides = [1, 1]} : vector<23x32xf32> to vector<1x32xf32>
    %270 = vector.broadcast %269 : vector<1x32xf32> to vector<32x32xf32>
    %271 = arith.addf %268, %270 : vector<32x32xf32>
    %c2_75 = arith.constant 2 : index
    %c0_76 = arith.constant 0 : index
    %c0_77 = arith.constant 0 : index
    %272 = vector.load %arg4[%c2_75, %c0_76, %c0_77] : memref<4x32x32xf32, #tpu.memory_space<vmem>>, vector<1x32x32xf32>
    %273 = vector.shape_cast %272 : vector<1x32x32xf32> to vector<32x32xf32>
    %cst_78 = arith.constant dense<0.000000e+00> : vector<32x32xf32>
    %274 = tpu.matmul %271, %273, %cst_78 {dimension_numbers = #tpu.dot_dimension_numbers<[1], [0], [0], [1], [0, 0, 1, 1], [], []>} : vector<32x32xf32>, vector<32x32xf32>, vector<32x32xf32> -> vector<32x32xf32>
    %275 = vector.extract_strided_slice %0 {offsets = [12, 0], sizes = [1, 32], strides = [1, 1]} : vector<23x32xf32> to vector<1x32xf32>
    %276 = vector.broadcast %275 : vector<1x32xf32> to vector<32x32xf32>
    %277 = arith.addf %274, %276 : vector<32x32xf32>
    %278 = math.tanh %277 : vector<32x32xf32>
    %279 = vector.extract_strided_slice %0 {offsets = [13, 0], sizes = [1, 32], strides = [1, 1]} : vector<23x32xf32> to vector<1x32xf32>
    %280 = vector.extract_strided_slice %0 {offsets = [14, 0], sizes = [1, 32], strides = [1, 1]} : vector<23x32xf32> to vector<1x32xf32>
    %cst_79 = arith.constant dense<0.000000e+00> : vector<32xf32>
    %281 = vector.multi_reduction <add>, %278, %cst_79 [1] : vector<32x32xf32> to vector<32xf32>
    %282 = vector.shape_cast %281 : vector<32xf32> to vector<32x1xf32>
    %cst_80 = arith.constant 3.200000e+01 : f32
    %283 = vector.broadcast %cst_80 : f32 to vector<32x1xf32>
    %284 = arith.divf %282, %283 : vector<32x1xf32>
    %285 = arith.mulf %278, %278 : vector<32x32xf32>
    %cst_81 = arith.constant dense<0.000000e+00> : vector<32xf32>
    %286 = vector.multi_reduction <add>, %285, %cst_81 [1] : vector<32x32xf32> to vector<32xf32>
    %287 = vector.shape_cast %286 : vector<32xf32> to vector<32x1xf32>
    %cst_82 = arith.constant 3.200000e+01 : f32
    %288 = vector.broadcast %cst_82 : f32 to vector<32x1xf32>
    %289 = arith.divf %287, %288 : vector<32x1xf32>
    %290 = arith.mulf %284, %284 : vector<32x1xf32>
    %291 = arith.subf %289, %290 : vector<32x1xf32>
    %292 = vector.broadcast %284 : vector<32x1xf32> to vector<32x32xf32>
    %293 = arith.subf %278, %292 : vector<32x32xf32>
    %cst_83 = arith.constant 9.99999974E-6 : f32
    %294 = vector.broadcast %cst_83 : f32 to vector<32x1xf32>
    %295 = arith.addf %291, %294 : vector<32x1xf32>
    %296 = math.rsqrt %295 : vector<32x1xf32>
    %297 = vector.broadcast %296 : vector<32x1xf32> to vector<32x32xf32>
    %298 = arith.mulf %293, %297 : vector<32x32xf32>
    %299 = vector.broadcast %279 : vector<1x32xf32> to vector<32x32xf32>
    %300 = arith.mulf %298, %299 : vector<32x32xf32>
    %301 = vector.broadcast %280 : vector<1x32xf32> to vector<32x32xf32>
    %302 = arith.addf %300, %301 : vector<32x32xf32>
    %c3 = arith.constant 3 : index
    %c0_84 = arith.constant 0 : index
    %c0_85 = arith.constant 0 : index
    %303 = vector.load %arg3[%c3, %c0_84, %c0_85] : memref<4x5x32xf32, #tpu.memory_space<vmem>>, vector<1x5x32xf32>
    %304 = vector.shape_cast %303 : vector<1x5x32xf32> to vector<5x32xf32>
    %305 = vector.extract_strided_slice %304 {offsets = [2, 0], sizes = [1, 32], strides = [1, 1]} : vector<5x32xf32> to vector<1x32xf32>
    %306 = vector.broadcast %305 : vector<1x32xf32> to vector<32x32xf32>
    %307 = arith.mulf %302, %306 : vector<32x32xf32>
    %cst_86 = arith.constant dense<0.000000e+00> : vector<32x32xf32>
    %308 = tpu.matmul %20, %302, %cst_86 {dimension_numbers = #tpu.dot_dimension_numbers<[1], [0], [0], [1], [0, 0, 1, 1], [], []>} : vector<32x32xf32>, vector<32x32xf32>, vector<32x32xf32> -> vector<32x32xf32>
    %309 = vector.extract_strided_slice %304 {offsets = [0, 0], sizes = [1, 32], strides = [1, 1]} : vector<5x32xf32> to vector<1x32xf32>
    %310 = vector.broadcast %309 : vector<1x32xf32> to vector<32x32xf32>
    %311 = arith.mulf %308, %310 : vector<32x32xf32>
    %312 = arith.addf %307, %311 : vector<32x32xf32>
    %cst_87 = arith.constant dense<0.000000e+00> : vector<32x32xf32>
    %313 = tpu.matmul %36, %302, %cst_87 {dimension_numbers = #tpu.dot_dimension_numbers<[1], [0], [0], [1], [0, 0, 1, 1], [], []>} : vector<32x32xf32>, vector<32x32xf32>, vector<32x32xf32> -> vector<32x32xf32>
    %314 = vector.extract_strided_slice %304 {offsets = [1, 0], sizes = [1, 32], strides = [1, 1]} : vector<5x32xf32> to vector<1x32xf32>
    %315 = vector.broadcast %314 : vector<1x32xf32> to vector<32x32xf32>
    %316 = arith.mulf %313, %315 : vector<32x32xf32>
    %317 = arith.addf %312, %316 : vector<32x32xf32>
    %cst_88 = arith.constant dense<0.000000e+00> : vector<32x32xf32>
    %318 = tpu.matmul %52, %302, %cst_88 {dimension_numbers = #tpu.dot_dimension_numbers<[1], [0], [0], [1], [0, 0, 1, 1], [], []>} : vector<32x32xf32>, vector<32x32xf32>, vector<32x32xf32> -> vector<32x32xf32>
    %319 = vector.extract_strided_slice %304 {offsets = [3, 0], sizes = [1, 32], strides = [1, 1]} : vector<5x32xf32> to vector<1x32xf32>
    %320 = vector.broadcast %319 : vector<1x32xf32> to vector<32x32xf32>
    %321 = arith.mulf %318, %320 : vector<32x32xf32>
    %322 = arith.addf %317, %321 : vector<32x32xf32>
    %cst_89 = arith.constant dense<0.000000e+00> : vector<32x32xf32>
    %323 = tpu.matmul %68, %302, %cst_89 {dimension_numbers = #tpu.dot_dimension_numbers<[1], [0], [0], [1], [0, 0, 1, 1], [], []>} : vector<32x32xf32>, vector<32x32xf32>, vector<32x32xf32> -> vector<32x32xf32>
    %324 = vector.extract_strided_slice %304 {offsets = [4, 0], sizes = [1, 32], strides = [1, 1]} : vector<5x32xf32> to vector<1x32xf32>
    %325 = vector.broadcast %324 : vector<1x32xf32> to vector<32x32xf32>
    %326 = arith.mulf %323, %325 : vector<32x32xf32>
    %327 = arith.addf %322, %326 : vector<32x32xf32>
    %328 = vector.extract_strided_slice %0 {offsets = [15, 0], sizes = [1, 32], strides = [1, 1]} : vector<23x32xf32> to vector<1x32xf32>
    %329 = vector.broadcast %328 : vector<1x32xf32> to vector<32x32xf32>
    %330 = arith.addf %327, %329 : vector<32x32xf32>
    %c3_90 = arith.constant 3 : index
    %c0_91 = arith.constant 0 : index
    %c0_92 = arith.constant 0 : index
    %331 = vector.load %arg4[%c3_90, %c0_91, %c0_92] : memref<4x32x32xf32, #tpu.memory_space<vmem>>, vector<1x32x32xf32>
    %332 = vector.shape_cast %331 : vector<1x32x32xf32> to vector<32x32xf32>
    %cst_93 = arith.constant dense<0.000000e+00> : vector<32x32xf32>
    %333 = tpu.matmul %330, %332, %cst_93 {dimension_numbers = #tpu.dot_dimension_numbers<[1], [0], [0], [1], [0, 0, 1, 1], [], []>} : vector<32x32xf32>, vector<32x32xf32>, vector<32x32xf32> -> vector<32x32xf32>
    %334 = vector.extract_strided_slice %0 {offsets = [16, 0], sizes = [1, 32], strides = [1, 1]} : vector<23x32xf32> to vector<1x32xf32>
    %335 = vector.broadcast %334 : vector<1x32xf32> to vector<32x32xf32>
    %336 = arith.addf %333, %335 : vector<32x32xf32>
    %337 = math.tanh %336 : vector<32x32xf32>
    %338 = vector.extract_strided_slice %0 {offsets = [17, 0], sizes = [1, 32], strides = [1, 1]} : vector<23x32xf32> to vector<1x32xf32>
    %339 = vector.extract_strided_slice %0 {offsets = [18, 0], sizes = [1, 32], strides = [1, 1]} : vector<23x32xf32> to vector<1x32xf32>
    %cst_94 = arith.constant dense<0.000000e+00> : vector<32xf32>
    %340 = vector.multi_reduction <add>, %337, %cst_94 [1] : vector<32x32xf32> to vector<32xf32>
    %341 = vector.shape_cast %340 : vector<32xf32> to vector<32x1xf32>
    %cst_95 = arith.constant 3.200000e+01 : f32
    %342 = vector.broadcast %cst_95 : f32 to vector<32x1xf32>
    %343 = arith.divf %341, %342 : vector<32x1xf32>
    %344 = arith.mulf %337, %337 : vector<32x32xf32>
    %cst_96 = arith.constant dense<0.000000e+00> : vector<32xf32>
    %345 = vector.multi_reduction <add>, %344, %cst_96 [1] : vector<32x32xf32> to vector<32xf32>
    %346 = vector.shape_cast %345 : vector<32xf32> to vector<32x1xf32>
    %cst_97 = arith.constant 3.200000e+01 : f32
    %347 = vector.broadcast %cst_97 : f32 to vector<32x1xf32>
    %348 = arith.divf %346, %347 : vector<32x1xf32>
    %349 = arith.mulf %343, %343 : vector<32x1xf32>
    %350 = arith.subf %348, %349 : vector<32x1xf32>
    %351 = vector.broadcast %343 : vector<32x1xf32> to vector<32x32xf32>
    %352 = arith.subf %337, %351 : vector<32x32xf32>
    %cst_98 = arith.constant 9.99999974E-6 : f32
    %353 = vector.broadcast %cst_98 : f32 to vector<32x1xf32>
    %354 = arith.addf %350, %353 : vector<32x1xf32>
    %355 = math.rsqrt %354 : vector<32x1xf32>
    %356 = vector.broadcast %355 : vector<32x1xf32> to vector<32x32xf32>
    %357 = arith.mulf %352, %356 : vector<32x32xf32>
    %358 = vector.broadcast %338 : vector<1x32xf32> to vector<32x32xf32>
    %359 = arith.mulf %357, %358 : vector<32x32xf32>
    %360 = vector.broadcast %339 : vector<1x32xf32> to vector<32x32xf32>
    %361 = arith.addf %359, %360 : vector<32x32xf32>
    %362 = arith.addf %361, %243 : vector<32x32xf32>
    %363 = vector.extract_strided_slice %0 {offsets = [21, 0], sizes = [1, 32], strides = [1, 1]} : vector<23x32xf32> to vector<1x32xf32>
    %364 = vector.extract_strided_slice %0 {offsets = [22, 0], sizes = [1, 32], strides = [1, 1]} : vector<23x32xf32> to vector<1x32xf32>
    %cst_99 = arith.constant dense<0.000000e+00> : vector<32xf32>
    %365 = vector.multi_reduction <add>, %362, %cst_99 [1] : vector<32x32xf32> to vector<32xf32>
    %366 = vector.shape_cast %365 : vector<32xf32> to vector<32x1xf32>
    %cst_100 = arith.constant 3.200000e+01 : f32
    %367 = vector.broadcast %cst_100 : f32 to vector<32x1xf32>
    %368 = arith.divf %366, %367 : vector<32x1xf32>
    %369 = arith.mulf %362, %362 : vector<32x32xf32>
    %cst_101 = arith.constant dense<0.000000e+00> : vector<32xf32>
    %370 = vector.multi_reduction <add>, %369, %cst_101 [1] : vector<32x32xf32> to vector<32xf32>
    %371 = vector.shape_cast %370 : vector<32xf32> to vector<32x1xf32>
    %cst_102 = arith.constant 3.200000e+01 : f32
    %372 = vector.broadcast %cst_102 : f32 to vector<32x1xf32>
    %373 = arith.divf %371, %372 : vector<32x1xf32>
    %374 = arith.mulf %368, %368 : vector<32x1xf32>
    %375 = arith.subf %373, %374 : vector<32x1xf32>
    %376 = vector.broadcast %368 : vector<32x1xf32> to vector<32x32xf32>
    %377 = arith.subf %362, %376 : vector<32x32xf32>
    %cst_103 = arith.constant 9.99999974E-6 : f32
    %378 = vector.broadcast %cst_103 : f32 to vector<32x1xf32>
    %379 = arith.addf %375, %378 : vector<32x1xf32>
    %380 = math.rsqrt %379 : vector<32x1xf32>
    %381 = vector.broadcast %380 : vector<32x1xf32> to vector<32x32xf32>
    %382 = arith.mulf %377, %381 : vector<32x32xf32>
    %383 = vector.broadcast %363 : vector<1x32xf32> to vector<32x32xf32>
    %384 = arith.mulf %382, %383 : vector<32x32xf32>
    %385 = vector.broadcast %364 : vector<1x32xf32> to vector<32x32xf32>
    %386 = arith.addf %384, %385 : vector<32x32xf32>
    %c0_104 = arith.constant 0 : index
    %c0_105 = arith.constant 0 : index
    %387 = vector.load %arg6[%c0_104, %c0_105] : memref<33x128xf32, #tpu.memory_space<vmem>>, vector<32x128xf32>
    %cst_106 = arith.constant dense<0.000000e+00> : vector<32x128xf32>
    %388 = tpu.matmul %386, %387, %cst_106 {dimension_numbers = #tpu.dot_dimension_numbers<[1], [0], [0], [1], [0, 0, 1, 1], [], []>} : vector<32x32xf32>, vector<32x128xf32>, vector<32x128xf32> -> vector<32x128xf32>
    %c32 = arith.constant 32 : index
    %c0_107 = arith.constant 0 : index
    %389 = vector.load %arg6[%c32, %c0_107] : memref<33x128xf32, #tpu.memory_space<vmem>>, vector<1x128xf32>
    %390 = vector.broadcast %389 : vector<1x128xf32> to vector<32x128xf32>
    %391 = arith.addf %388, %390 : vector<32x128xf32>
    %392 = vector.shape_cast %391 : vector<32x128xf32> to vector<2x16x128xf32>
    %c0_108 = arith.constant 0 : index
    %c0_109 = arith.constant 0 : index
    %c0_110 = arith.constant 0 : index
    %393 = vector.load %arg7[%c0_108, %c0_109, %c0_110] : memref<2x16x128xf32, #tpu.memory_space<vmem>>, vector<2x16x128xf32>
    tpu.vector_store %arg7[%c0_108, %c0_109, %c0_110], %392 {strides = array<i32>} : memref<2x16x128xf32, #tpu.memory_space<vmem>>, vector<2x16x128xf32>,
    return
  }
  func.func @transform_0(%arg0: i32) -> (i32, i32, i32) {
    %c0_i32 = arith.constant 0 : i32
    %c0_i32_0 = arith.constant 0 : i32
    %c0_i32_1 = arith.constant 0 : i32
    %c0_i32_2 = arith.constant 0 : i32
    return %c0_i32, %c0_i32_0, %c0_i32_1 : i32, i32, i32
  }
  func.func @transform_1(%arg0: i32) -> (i32, i32) {
    %c0_i32 = arith.constant 0 : i32
    %c0_i32_0 = arith.constant 0 : i32
    %c0_i32_1 = arith.constant 0 : i32
    return %c0_i32, %c0_i32_0 : i32, i32
  }
  func.func @transform_2(%arg0: i32) -> (i32, i32, i32) {
    %c0_i32 = arith.constant 0 : i32
    %c0_i32_0 = arith.constant 0 : i32
    %c0_i32_1 = arith.constant 0 : i32
    %c0_i32_2 = arith.constant 0 : i32
    return %c0_i32, %c0_i32_0, %c0_i32_1 : i32, i32, i32
  }
  func.func @transform_3(%arg0: i32) -> (i32, i32, i32) {
    %c0_i32 = arith.constant 0 : i32
    %c0_i32_0 = arith.constant 0 : i32
    %c0_i32_1 = arith.constant 0 : i32
    %c0_i32_2 = arith.constant 0 : i32
    return %c0_i32, %c0_i32_0, %c0_i32_1 : i32, i32, i32
  }
  func.func @transform_4(%arg0: i32) -> (i32, i32) {
    %c0_i32 = arith.constant 0 : i32
    %c0_i32_0 = arith.constant 0 : i32
    %c0_i32_1 = arith.constant 0 : i32
    return %c0_i32, %c0_i32_0 : i32, i32
  }
  func.func @transform_5(%arg0: i32) -> (i32, i32) {
    %c0_i32 = arith.constant 0 : i32
    %c0_i32_0 = arith.constant 0 : i32
    %c0_i32_1 = arith.constant 0 : i32
    return %c0_i32, %c0_i32_0 : i32, i32
  }
  func.func @transform_6(%arg0: i32) -> (i32, i32, i32) {
    %c0_i32 = arith.constant 0 : i32
    %c0_i32_0 = arith.constant 0 : i32
    %c0_i32_1 = arith.constant 0 : i32
    %c0_i32_2 = arith.constant 0 : i32
    return %c0_i32, %c0_i32_0, %c0_i32_1 : i32, i32, i32
  }
}

</mosaic_0001>

<bundles_post_ra>
// kernel: tpu_custom_call.1
= control target key start
LH: loop header
LB: loop body
LE: loop exit
PB: predicated region body
PF: predicated region fallthrough
CT: control target
= control target key end

     0   :  { %11 = vsyncpa [#allocation3], 0  ;;  %s4741_s0 = inlined_call_operand.hbm [shape: f32[2,16,32], index: 0, kind: input, shape index: {}]   ;;  %s4742_s1 = inlined_call_operand.hbm [shape: f32[32,32], index: 1, kind: input, shape index: {}]   ;;  %s4743_s2 = inlined_call_operand.vmem [shape: f32[4,5,32], index: 2, kind: input, shape index: {}]   ;;  %s4744_s3 = inlined_call_operand.hbm [shape: f32[4,32,32], index: 3, kind: input, shape index: {}]   ;;  %s4745_s4 = inlined_call_operand.vmem [shape: f32[23,32], index: 4, kind: input, shape index: {}]   ;;  %s4746_s5 = inlined_call_operand.vmem [shape: f32[33,128], index: 5, kind: input, shape index: {}]   ;;  %s4747_s6 = inlined_call_operand.hbm [shape: f32[2,16,128], index: 6, kind: output, shape index: {}]  }
   0x1   :  { %12 = vsyncpa [#allocation6], 0 }
   0x2   :  { %13 = vsyncpa [#allocation4], 0  ;;  %s4013_s21 = smov [#allocation5]   ;;  %s4014_s23 = smov [#allocation2]  }
   0x3   :  { %s31_s22 = sshll.u32 %s4013_s21, 4  ;;  %s19_s24 = sshll.u32 %s4014_s23, 4  ;;  %s32_s22 = int_to_ptr.vmem [resolvable:$true] %s31_s22  ;;  %s4055_s24 = int_to_ptr.vmem [resolvable:$true] %s19_s24 }
   0x4   :  { %s3919_s27 = scalar_lea.hbm %s4742_s1, 512 }
   0x5   :  { %p3920_p0 = scmp.ne.s32.totalorder %s4742_s1, %s3919_s27  ;;  %p3923_p1 = scmp.lt.u32.totalorder %s3919_s27, %s4742_s1 }
   0x7   :  { %p3925_p2 = pnand %p3923_p1, %p3920_p0 }
   0x9   :  { %3928 = shalt.err (!%p3925_p2)
}
   0xa   :  { %s3929_s8 = scalar_lea.vmem %s32_s22, 512  ;;  %p3934_p4 = scmp.lt.s32.totalorder %s32_s22, %s32_s22 }
   0xb   :  { %p3930_p3 = scmp.ne.s32.totalorder %s32_s22, %s3929_s8  ;;  %p3935_p5 = scmp.lt.s32.totalorder %s3929_s8, %s3929_s8 }
   0xd   :  { %p3936_p6 = por %p3935_p5, %p3934_p4 }
   0xf   :  { %p3937_p7 = pnand %p3936_p6, %p3930_p3 }
  0x11   :  { %3940 = shalt.err (!%p3937_p7)
}
  0x12   :  { %s4015_s9 = smov 128   ;;  %s4016_s10 = smov 8  }
  0x13   :  { %37 = dma.hbm_to_vmem [thread:$0]  %s4742_s1, 512, %s32_s22, [#allocation6], %s4015_s9, %s4015_s9, %s4016_s10  }
  0x14   :  { %s3941_s15 = scalar_lea.hbm %s4741_s0, 512 }
  0x15   :  { %p3942_p8 = scmp.ne.s32.totalorder %s4741_s0, %s3941_s15  ;;  %p3945_p9 = scmp.lt.u32.totalorder %s3941_s15, %s4741_s0 }
  0x17   :  { %p3947_p10 = pnand %p3945_p9, %p3942_p8 }
  0x19   :  { %3950 = shalt.err (!%p3947_p10)
}
  0x1a   :  { %s3951_s20 = scalar_lea.vmem %s4055_s24, 512  ;;  %p3956_p12 = scmp.lt.s32.totalorder %s4055_s24, %s4055_s24 }
  0x1b   :  { %p3952_p11 = scmp.ne.s32.totalorder %s4055_s24, %s3951_s20  ;;  %p3957_p13 = scmp.lt.s32.totalorder %s3951_s20, %s3951_s20 }
  0x1d   :  { %p3958_p0 = por %p3957_p13, %p3956_p12 }
  0x1f   :  { %p3959_p1 = pnand %p3958_p0, %p3952_p11 }
  0x21   :  { %3962 = shalt.err (!%p3959_p1)
}
  0x22   :  { %25 = dma.hbm_to_vmem [thread:$0]  %s4741_s0, 512, %s4055_s24, [#allocation3], %s4015_s9, %s4015_s9, %s4016_s10  }
  0x23   :  { %s4017_s22 = smov [#allocation7]   ;;  %s3963_s27 = scalar_lea.hbm %s4744_s3, 2048 }
  0x24   :  { %s45_s23 = sshll.u32 %s4017_s22, 4  ;;  %p3964_p2 = scmp.ne.s32.totalorder %s4744_s3, %s3963_s27  ;;  %s46_s23 = int_to_ptr.vmem [resolvable:$true] %s45_s23 }
  0x25   :  { %p3967_p3 = scmp.lt.u32.totalorder %s3963_s27, %s4744_s3 }
  0x27   :  { %p3969_p4 = pnand %p3967_p3, %p3964_p2 }
  0x29   :  { %3972 = shalt.err (!%p3969_p4)
}
  0x2a   :  { %s3973_s8 = scalar_lea.vmem %s46_s23, 2048  ;;  %p3978_p6 = scmp.lt.s32.totalorder %s46_s23, %s46_s23 }
  0x2b   :  { %p3974_p5 = scmp.ne.s32.totalorder %s46_s23, %s3973_s8  ;;  %p3979_p7 = scmp.lt.s32.totalorder %s3973_s8, %s3973_s8 }
  0x2d   :  { %p3980_p8 = por %p3979_p7, %p3978_p6 }
  0x2f   :  { %p3981_p9 = pnand %p3980_p8, %p3974_p5 }
  0x31   :  { %3984 = shalt.err (!%p3981_p9)
}
  0x32   :  { %51 = dma.hbm_to_vmem [thread:$0]  %s4744_s3, 2048, %s46_s23, [#allocation6], %s4015_s9, %s4015_s9, %s4016_s10  }
  0x33   :  { %4007 = dma.done.wait [#allocation3], 512  }
  0x34   :  { %4008 = vsyncadd [#allocation3], 4294966784 }
  0x35   :  { %4009 = dma.done.wait [#allocation6], 2560  }
  0x36   :  { %4010 = vsyncadd [#allocation6], 4294964736  ;;  %vm183_vm0 = vcmask 261120   ;;  %v175_v0 = vld [vmem:[#allocation5] sm:$0xff]  ;;  %v176_v1 = vld [vmem:[#allocation5 + $0x8] sm:$0xff]  ;;  %v68_v10 = vlaneseq  ;;  %v4018_v46 = vmov 0.0  }
  0x37   :  { %v177_v2 = vld [vmem:[#allocation5 + $0x10] sm:$0xff]  ;;  %v3640_v3 = vpack.c.bf16 %v176_v1, %v175_v0  ;;  %v178_v4 = vld [vmem:[#allocation5 + $0x18] sm:$0xff]  ;;  %v171_v5 = vld [vmem:[#allocation2] sm:$0xff]  ;;  %s4019_s8 = smov [#allocation8]  }
  0x38   :  { %v3644_v6 = vpack.c.bf16 %v178_v4, %v177_v2  ;;  %3340 = vmatprep.mubr.msk.f32.mxu0 %vm183_vm0, %v171_v5  ;;  %v172_v7 = vld [vmem:[#allocation2 + $0x8] sm:$0xff]  ;;  %v173_v8 = vld [vmem:[#allocation2 + $0x10] sm:$0xff]  ;;  %v174_v9 = vld [vmem:[#allocation2 + $0x18] sm:$0xff]  ;;  %v4111_v11 = vshrl.u32 %v68_v10, 7  ;;  %v4151_v39 = vand.u32 127, %v68_v10  ;;  %s3051_s0 = sshll.u32 %s4019_s8, 4  ;;  %s3052_s0 = int_to_ptr.vmem [resolvable:$true] %s3051_s0 }
  0x39   :  { %3641 = vmatprep.subr.bf16.mxu0 %v3640_v3  ;;  %v4119_v13 = vld [vmem:[%s4745_s4] sm:$0xff]  ;;  %s3985_s24 = scalar_lea.vmem %s3052_s0, 512  ;;  %p3990_p11 = scmp.lt.s32.totalorder %s3052_s0, %s3052_s0 }
  0x3a   :  { %3643 = vmatpush3.bf16.msra.mxu0 %v3640_v3  ;;  %v4114_v12 = vsub.s32 0, %v4111_v11  ;;  %v75_v40 = vadd.s32 4294967294, %v4111_v11  ;;  %v70_v41 = vadd.s32 8, %v4111_v11  ;;  %v99_v42 = vadd.s32 4294967295, %v4111_v11  ;;  %p3986_p10 = scmp.ne.s32.totalorder %s3052_s0, %s3985_s24  ;;  %p3991_p12 = scmp.lt.s32.totalorder %s3985_s24, %s3985_s24 }
  0x3b   :  { %3645 = vmatprep.subr.bf16.mxu0 %v3644_v6  ;;  %v71_v44 = vadd.s32 16, %v4111_v11  ;;  %v72_v49 = vadd.s32 24, %v4111_v11  ;;  %v123_v59 = vadd.s32 1, %v4111_v11  ;;  %v147_v62 = vadd.s32 2, %v4111_v11 }
  0x3c   :  { %v182_v14 = vrot.slane %v4119_v13, %v4114_v12  ;;  %vm79_vm1 = vcmp.eq.s32.totalorder %v4151_v39, %v75_v40  ;;  %vm83_vm2 = vcmp.ge.s32.totalorder %v75_v40, 0  ;;  %v76_v43 = vadd.s32 4294967294, %v70_v41  ;;  %p3992_p13 = por %p3991_p12, %p3990_p11 }
  0x3d   :  { %vm85_vm3 = vmand %vm79_vm1, %vm83_vm2  ;;  %vm103_vm4 = vcmp.eq.s32.totalorder %v4151_v39, %v99_v42  ;;  %vm107_vm5 = vcmp.ge.s32.totalorder %v99_v42, 0  ;;  %v100_v45 = vadd.s32 4294967295, %v70_v41  ;;  %v77_v48 = vadd.s32 4294967294, %v71_v44 }
  0x3e   :  { %3647 = vmatpush3.bf16.msra.mxu0 %v3644_v6  ;;  %v4160_v47 = vsel %vm85_vm3, 1.0, %v4018_v46  ;;  %vm80_vm6 = vcmp.eq.s32.totalorder %v4151_v39, %v76_v43  ;;  %vm109_vm7 = vmand %vm103_vm4, %vm107_vm5  ;;  %v101_v52 = vadd.s32 4294967295, %v71_v44  ;;  %v78_v54 = vadd.s32 4294967294, %v72_v49  ;;  %p3993_p0 = pnand %p3992_p13, %p3986_p10 }
  0x3f   :  { %3354 = vmatprep.mubr.msk.f32.mxu1 %vm183_vm0, %v4160_v47  ;;  %v4167_v50 = vsel %vm80_vm6, 1.0, %v4018_v46  ;;  %v4169_v51 = vsel %vm109_vm7, 1.0, %v4018_v46  ;;  %vm104_vm8 = vcmp.eq.s32.totalorder %v4151_v39, %v100_v45  ;;  %vm81_vm9 = vcmp.eq.s32.totalorder %v4151_v39, %v77_v48 }
  0x40   :  { %v4174_v53 = vsel %vm104_vm8, 1.0, %v4018_v46  ;;  %vm87_vm10 = vmand %vm81_vm9, %vm83_vm2  ;;  %vm105_vm11 = vcmp.eq.s32.totalorder %v4151_v39, %v101_v52  ;;  %v102_v55 = vadd.s32 4294967295, %v72_v49  ;;  %vm82_vm12 = vcmp.eq.s32.totalorder %v4151_v39, %v78_v54 }
  0x41   :  { %3341 = vmatmul.mubr.msk.f32.vlgmr.msra.gmra.mrb[0].mxu0 %vm183_vm0, %v172_v7  ;;  %v4179_v56 = vsel %vm87_vm10, 1.0, %v4018_v46  ;;  %vm111_vm13 = vmand %vm105_vm11, %vm107_vm5  ;;  %v4183_v57 = vsel %vm82_vm12, 1.0, %v4018_v46  ;;  %v124_v61 = vadd.s32 1, %v70_v41  ;;  %v148_v63 = vadd.s32 2, %v70_v41 }
  0x42   :  { %3343 = vmatprep.mubr.msk.f32.mxu0 %vm183_vm0, %v173_v8  ;;  %v4185_v58 = vsel %vm111_vm13, 1.0, %v4018_v46  ;;  %vm106_vm14 = vcmp.eq.s32.totalorder %v4151_v39, %v102_v55  ;;  %vm127_vm15 = vcmp.eq.s32.totalorder %v4151_v39, %v123_v59  ;;  %vm151_vm3 = vcmp.eq.s32.totalorder %v4151_v39, %v147_v62 }
  0x43   :  { %v4189_v60 = vsel %vm106_vm14, 1.0, %v4018_v46  ;;  %v4193_v0 = vsel %vm127_vm15, 1.0, %v4018_v46  ;;  %vm128_vm1 = vcmp.eq.s32.totalorder %v4151_v39, %v124_v61  ;;  %vm138_vm2 = vcmp.lt.s32.totalorder %v124_v61, 16 }
  0x44   :  { %vm140_vm4 = vmand %vm128_vm1, %vm138_vm2  ;;  %v4198_v1 = vsel %vm151_vm3, 1.0, %v4018_v46  ;;  %vm152_vm5 = vcmp.eq.s32.totalorder %v4151_v39, %v148_v63  ;;  %vm162_vm6 = vcmp.lt.s32.totalorder %v148_v63, 16  ;;  %v125_v2 = vadd.s32 1, %v71_v44 }
  0x45   :  { %3344 = vmatmul.mubr.msk.f32.gmra.mrb[2].mxu0 %vm183_vm0, %v174_v9  ;;  %v4201_v3 = vsel %vm140_vm4, 1.0, %v4018_v46  ;;  %vm164_vm7 = vmand %vm152_vm5, %vm162_vm6  ;;  %v126_v4 = vadd.s32 1, %v72_v49  ;;  %v149_v6 = vadd.s32 2, %v71_v44  ;;  %v150_v7 = vadd.s32 2, %v72_v49 }
  0x46   :  { %3368 = vmatprep.mubr.msk.f32.mxu0 %vm183_vm0, %v4169_v51  ;;  %v4204_v5 = vsel %vm164_vm7, 1.0, %v4018_v46  ;;  %vm129_vm8 = vcmp.eq.s32.totalorder %v4151_v39, %v125_v2  ;;  %v4221_v44 = vsub.s32 1, %v4111_v11  ;;  %v4227_v55 = vsub.s32 2, %v4111_v11 }
  0x47   :  { %v4207_v8 = vsel %vm129_vm8, 1.0, %v4018_v46  ;;  %vm130_vm9 = vcmp.eq.s32.totalorder %v4151_v39, %v126_v4  ;;  %vm153_vm11 = vcmp.eq.s32.totalorder %v4151_v39, %v149_v6  ;;  %vm154_vm12 = vcmp.eq.s32.totalorder %v4151_v39, %v150_v7 }
  0x48   :  { %vm142_vm10 = vmand %vm130_vm9, %vm138_vm2  ;;  %v4215_v10 = vsel %vm153_vm11, 1.0, %v4018_v46  ;;  %v349_v54 = vrot.slane %v4119_v13, %v4221_v44  ;;  %v357_v63 = vrot.slane %v4119_v13, %v4227_v55 }
  0x49   :  { %v4213_v9 = vsel %vm142_vm10, 1.0, %v4018_v46  ;;  %vm166_vm13 = vmand %vm154_vm12, %vm162_vm6 }
 0x114   :  { %v3342_v15 = vpop.f32.mrb[0].mxu0 }
 0x115   :  { %v268_v16 = vadd.f32 %v3342_v15, %v182_v14  ;;  %v262_v17 = vpop.f32.mrb[1].mxu0 }
 0x116   :  { %v263_v18 = vadd.f32 %v262_v17, %v182_v14 }
 0x117   :  { %3823 = vtanh.f32 %v268_v16 }
 0x118   :  { %3825 = vtanh.f32 %v263_v18  ;;  %v3345_v19 = vpop.f32.mrb[2].mxu0 }
 0x119   :  { %v278_v20 = vadd.f32 %v3345_v19, %v182_v14  ;;  %v272_v21 = vpop.f32.mrb[3].mxu0 }
 0x11a   :  { %v273_v22 = vadd.f32 %v272_v21, %v182_v14  ;;  %v4218_v14 = vsel %vm166_vm13, 1.0, %v4018_v46 }
 0x11c   :  { %3827 = vtanh.f32 %v273_v22 }
 0x11d   :  { %3829 = vtanh.f32 %v278_v20 }
 0x121   :  { %v4123_v23 = vpop.eup %3823 }
 0x122   :  { %v4125_v24 = vpop.eup %3825  ;;  %v288_v25 = vsel %vm183_vm0, %v4123_v23, 0.0  ;;  %v303_v26 = vmul.f32 %v4123_v23, %v4123_v23 }
 0x123   :  { %289 = vadd.xlane.f32.xlu0 %v288_v25  ;;  %v302_v28 = vmul.f32 %v4125_v24, %v4125_v24  ;;  %v285_v30 = vsel %vm183_vm0, %v4125_v24, 0.0 }
 0x124   :  { %v309_v27 = vsel %vm183_vm0, %v303_v26, 0.0 }
 0x125   :  { %310 = vadd.xlane.f32.xlu1 %v309_v27  ;;  %v306_v32 = vsel %vm183_vm0, %v302_v28, 0.0 }
 0x126   :  { %v4134_v29 = vpop.eup %3827 }
 0x127   :  { %v4138_v31 = vpop.eup %3829  ;;  %286 = vadd.xlane.f32.xlu0 %v285_v30  ;;  %v291_v33 = vsel %vm183_vm0, %v4134_v29, 0.0  ;;  %v304_v34 = vmul.f32 %v4134_v29, %v4134_v29 }
 0x128   :  { %v294_v35 = vsel %vm183_vm0, %v4138_v31, 0.0  ;;  %v305_v37 = vmul.f32 %v4138_v31, %v4138_v31 }
 0x129   :  { %307 = vadd.xlane.f32.xlu1 %v306_v32  ;;  %v312_v36 = vsel %vm183_vm0, %v304_v34, 0.0 }
 0x12a   :  { %v315_v38 = vsel %vm183_vm0, %v305_v37, 0.0 }
 0x12b   :  { %292 = vadd.xlane.f32.xlu0 %v291_v33 }
 0x12d   :  { %295 = vadd.xlane.f32.xlu1 %v294_v35 }
 0x12f   :  { %313 = vadd.xlane.f32.xlu0 %v312_v36 }
 0x131   :  { %316 = vadd.xlane.f32.xlu1 %v315_v38 }
 0x1b0   :  { %v290_v15 = vpop.xlane.xlu0 %289 }
 0x1b1   :  { %v299_v16 = vmul.f32 0.03125, %v290_v15 }
 0x1b2   :  { %v311_v17 = vpop.xlane.xlu1 %310 }
 0x1b3   :  { %v323_v18 = vmul.f32 %v299_v16, %v299_v16  ;;  %v319_v19 = vmul.f32 0.03125, %v311_v17  ;;  %v331_v48 = vsub.f32 %v4123_v23, %v299_v16 }
 0x1b4   :  { %v287_v20 = vpop.xlane.xlu0 %286 }
 0x1b5   :  { %v327_v21 = vsub.f32 %v319_v19, %v323_v18  ;;  %v298_v22 = vmul.f32 0.03125, %v287_v20 }
 0x1b6   :  { %v308_v25 = vpop.xlane.xlu1 %307 }
 0x1b7   :  { %v335_v26 = vadd.f32 1e-05, %v327_v21  ;;  %v322_v27 = vmul.f32 %v298_v22, %v298_v22  ;;  %v318_v28 = vmul.f32 0.03125, %v308_v25  ;;  %v330_v61 = vsub.f32 %v4125_v24, %v298_v22 }
 0x1b8   :  { %v293_v30 = vpop.xlane.xlu0 %292 }
 0x1b9   :  { %3831 = vrsqrt.f32 %v335_v26  ;;  %v326_v32 = vsub.f32 %v318_v28, %v322_v27  ;;  %v300_v33 = vmul.f32 0.03125, %v293_v30  ;;  %v816_v27 = vld [vmem:[#allocation7 + $0x8] sm:$0xff]  ;;  %v817_v30 = vld [vmem:[#allocation7 + $0x10] sm:$0xff] }
 0x1ba   :  { %v296_v34 = vpop.xlane.xlu1 %295 }
 0x1bb   :  { %v334_v35 = vadd.f32 1e-05, %v326_v32  ;;  %v324_v36 = vmul.f32 %v300_v33, %v300_v33  ;;  %v301_v37 = vmul.f32 0.03125, %v296_v34  ;;  %v332_v15 = vsub.f32 %v4134_v29, %v300_v33  ;;  %v818_v32 = vld [vmem:[#allocation7 + $0x18] sm:$0xff]  ;;  %v362_v34 = vld [vmem:[%s4743_s2] sm:$0x1f] }
 0x1bc   :  { %v314_v38 = vpop.xlane.xlu0 %313  ;;  %v3684_v33 = vpack.c.bf16 %v818_v32, %v817_v30 }
 0x1bd   :  { %3833 = vrsqrt.f32 %v334_v35  ;;  %v320_v39 = vmul.f32 0.03125, %v314_v38  ;;  %v325_v41 = vmul.f32 %v301_v37, %v301_v37  ;;  %v333_v18 = vsub.f32 %v4138_v31, %v301_v37  ;;  %v815_v31 = vld [vmem:[#allocation7] sm:$0xff] }
 0x1be   :  { %v317_v40 = vpop.xlane.xlu1 %316  ;;  %v3680_v28 = vpack.c.bf16 %v816_v27, %v815_v31  ;;  %v366_v35 = vrot.slane %v362_v34, %v4227_v55  ;;  %v580_v37 = vrot.slane %v362_v34, %v4221_v44 }
 0x1bf   :  { %v328_v42 = vsub.f32 %v320_v39, %v324_v36  ;;  %v321_v43 = vmul.f32 0.03125, %v317_v40  ;;  %v471_v36 = vrot.slane %v362_v34, %v4114_v12  ;;  %v4283_v40 = vsub.s32 3, %v4111_v11 }
 0x1c1   :  { %v336_v45 = vadd.f32 1e-05, %v328_v42  ;;  %v329_v46 = vsub.f32 %v321_v43, %v325_v41 }
 0x1c3   :  { %v3832_v49 = vpop.eup %3831  ;;  %3835 = vrsqrt.f32 %v336_v45  ;;  %v337_v52 = vadd.f32 1e-05, %v329_v46 }
 0x1c4   :  { %v343_v59 = vmul.f32 %v3832_v49, %v331_v48  ;;  %v4287_v48 = vsub.s32 4, %v4111_v11 }
 0x1c5   :  { %3837 = vrsqrt.f32 %v337_v52 }
 0x1c6   :  { %v351_v2 = vmul.f32 %v349_v54, %v343_v59 }
 0x1c7   :  { %v3834_v62 = vpop.eup %3833 }
 0x1c8   :  { %v342_v4 = vmul.f32 %v3834_v62, %v330_v61  ;;  %v4232_v6 = vadd.f32 %v357_v63, %v351_v2 }
 0x1ca   :  { %v350_v23 = vmul.f32 %v349_v54, %v342_v4  ;;  %v368_v41 = vmul.f32 %v366_v35, %v4232_v6  ;;  %v689_v4 = vrot.slane %v362_v34, %v4283_v40 }
 0x1cc   :  { %v4234_v7 = vadd.f32 %v357_v63, %v350_v23 }
 0x1cd   :  { %v3836_v16 = vpop.eup %3835 }
 0x1ce   :  { %v3648_v17 = vpack.c.bf16 %v4232_v6, %v4234_v7  ;;  %v344_v24 = vmul.f32 %v3836_v16, %v332_v15  ;;  %v367_v49 = vmul.f32 %v366_v35, %v4234_v7 }
 0x1cf   :  { %v3838_v19 = vpop.eup %3837 }
 0x1d0   :  { %v352_v20 = vmul.f32 %v349_v54, %v344_v24  ;;  %v345_v21 = vmul.f32 %v3838_v19, %v333_v18  ;;  %3649 = vmatprep.subr.bf16.mxu1 %v3648_v17  ;;  %3657 = vmatprep.subr.bf16.mxu0 %v3648_v17  ;;  %v798_v24 = vrot.slane %v362_v34, %v4287_v48 }
 0x1d1   :  { %3651 = vmatpush3.bf16.msra.mxu1 %v3648_v17  ;;  %3659 = vmatpush3.bf16.msra.mxu0 %v3648_v17  ;;  %v810_v34 = vrot.slane %v4119_v13, %v4283_v40 }
 0x1d2   :  { %v353_v22 = vmul.f32 %v349_v54, %v345_v21  ;;  %v4240_v25 = vadd.f32 %v357_v63, %v352_v20 }
 0x1d4   :  { %v4242_v26 = vadd.f32 %v357_v63, %v353_v22  ;;  %v369_v20 = vmul.f32 %v366_v35, %v4240_v25 }
 0x1d6   :  { %v3652_v29 = vpack.c.bf16 %v4242_v26, %v4240_v25  ;;  %v370_v62 = vmul.f32 %v366_v35, %v4242_v26 }
 0x1d8   :  { %3653 = vmatprep.subr.bf16.mxu1 %v3652_v29  ;;  %3661 = vmatprep.subr.bf16.mxu0 %v3652_v29 }
 0x1d9   :  { %3655 = vmatpush3.bf16.msra.mxu1 %v3652_v29  ;;  %3663 = vmatpush3.bf16.msra.mxu0 %v3652_v29 }
 0x1da   :  { %3665 = vmatprep.subr.bf16.mxu1 %v3648_v17  ;;  %3673 = vmatprep.subr.bf16.mxu0 %v3648_v17 }
 0x1dc   :  { %3355 = vmatmul.mubr.msk.f32.vlgmr.msra.gmra.mrb[0].mxu1 %vm183_vm0, %v4167_v50  ;;  %3369 = vmatmul.mubr.msk.f32.vlgmr.msra.gmra.mrb[4].mxu0 %vm183_vm0, %v4174_v53 }
 0x1dd   :  { %3667 = vmatpush3.bf16.msra.mxu1 %v3648_v17  ;;  %3675 = vmatpush3.bf16.msra.mxu0 %v3648_v17 }
 0x1de   :  { %3669 = vmatprep.subr.bf16.mxu1 %v3652_v29  ;;  %3677 = vmatprep.subr.bf16.mxu0 %v3652_v29 }
 0x1df   :  { %3357 = vmatprep.mubr.msk.f32.mxu1 %vm183_vm0, %v4179_v56  ;;  %3371 = vmatprep.mubr.msk.f32.mxu0 %vm183_vm0, %v4185_v58 }
 0x1e0   :  { %3358 = vmatmul.mubr.msk.f32.gmra.mrb[2].mxu1 %vm183_vm0, %v4183_v57  ;;  %3372 = vmatmul.mubr.msk.f32.gmra.mrb[6].mxu0 %vm183_vm0, %v4189_v60 }
 0x1e1   :  { %3671 = vmatpush3.bf16.msra.mxu1 %v3652_v29  ;;  %3679 = vmatpush3.bf16.msra.mxu0 %v3652_v29 }
 0x1e2   :  { %3382 = vmatprep.mubr.msk.f32.mxu1 %vm183_vm0, %v4193_v0  ;;  %3396 = vmatprep.mubr.msk.f32.mxu0 %vm183_vm0, %v4198_v1 }
 0x1e3   :  { %3681 = vmatprep.subr.bf16.mxu1 %v3680_v28 }
 0x1e4   :  { %3383 = vmatmul.mubr.msk.f32.vlgmr.msra.gmra.mrb[4].mxu1 %vm183_vm0, %v4201_v3  ;;  %3397 = vmatmul.mubr.msk.f32.vlgmr.msra.gmra.mrb[8].mxu0 %vm183_vm0, %v4204_v5 }
 0x1e5   :  { %3385 = vmatprep.mubr.msk.f32.mxu1 %vm183_vm0, %v4207_v8  ;;  %3399 = vmatprep.mubr.msk.f32.mxu0 %vm183_vm0, %v4215_v10 }
 0x1e6   :  { %3683 = vmatpush3.bf16.msra.mxu1 %v3680_v28 }
 0x1e7   :  { %3685 = vmatprep.subr.bf16.mxu1 %v3684_v33 }
 0x1e8   :  { %3386 = vmatmul.mubr.msk.f32.gmra.mrb[6].mxu1 %vm183_vm0, %v4213_v9  ;;  %3400 = vmatmul.mubr.msk.f32.gmra.mrb[10].mxu0 %vm183_vm0, %v4218_v14 }
 0x1e9   :  { %3424 = vmatprep.mubr.msk.f32.mxu0 %vm183_vm0, %v4160_v47 }
 0x1ea   :  { %3687 = vmatpush3.bf16.msra.mxu1 %v3684_v33 }
 0x2af   :  { %v3356_v38 = vpop.f32.mrb[0].mxu1  ;;  %v3370_v39 = vpop.f32.mrb[4].mxu0 }
 0x2b0   :  { %v473_v42 = vmul.f32 %v3356_v38, %v471_v36  ;;  %v449_v43 = vpop.f32.mrb[1].mxu1  ;;  %v582_v45 = vmul.f32 %v3370_v39, %v580_v37  ;;  %v558_v46 = vpop.f32.mrb[5].mxu0 }
 0x2b1   :  { %v472_v52 = vmul.f32 %v471_v36, %v449_v43  ;;  %v581_v54 = vmul.f32 %v580_v37, %v558_v46 }
 0x2b2   :  { %v477_v59 = vadd.f32 %v473_v42, %v368_v41 }
 0x2b3   :  { %v476_v61 = vadd.f32 %v472_v52, %v367_v49  ;;  %v3359_v63 = vpop.f32.mrb[2].mxu1  ;;  %v3373_v2 = vpop.f32.mrb[6].mxu0 }
 0x2b4   :  { %v586_v23 = vadd.f32 %v582_v45, %v477_v59  ;;  %v475_v15 = vmul.f32 %v3359_v63, %v471_v36  ;;  %v459_v16 = vpop.f32.mrb[3].mxu1  ;;  %v584_v17 = vmul.f32 %v3373_v2, %v580_v37  ;;  %v568_v18 = vpop.f32.mrb[7].mxu0 }
 0x2b5   :  { %v585_v19 = vadd.f32 %v581_v54, %v476_v61  ;;  %v474_v21 = vmul.f32 %v471_v36, %v459_v16  ;;  %v583_v22 = vmul.f32 %v580_v37, %v568_v18 }
 0x2b6   :  { %v479_v29 = vadd.f32 %v475_v15, %v370_v62 }
 0x2b7   :  { %v478_v31 = vadd.f32 %v474_v21, %v369_v20  ;;  %v3384_v27 = vpop.f32.mrb[4].mxu1  ;;  %v3398_v28 = vpop.f32.mrb[8].mxu0 }
 0x2b8   :  { %v588_v30 = vadd.f32 %v584_v17, %v479_v29  ;;  %v691_v32 = vmul.f32 %v3384_v27, %v689_v4  ;;  %v667_v33 = vpop.f32.mrb[5].mxu1  ;;  %v800_v38 = vmul.f32 %v3398_v28, %v798_v24  ;;  %v776_v39 = vpop.f32.mrb[9].mxu0 }
 0x2b9   :  { %v587_v41 = vadd.f32 %v583_v22, %v478_v31  ;;  %v690_v42 = vmul.f32 %v689_v4, %v667_v33  ;;  %v799_v43 = vmul.f32 %v798_v24, %v776_v39 }
 0x2ba   :  { %v695_v45 = vadd.f32 %v691_v32, %v586_v23 }
 0x2bb   :  { %v694_v46 = vadd.f32 %v690_v42, %v585_v19  ;;  %v3387_v35 = vpop.f32.mrb[6].mxu1  ;;  %v3401_v36 = vpop.f32.mrb[10].mxu0 }
 0x2bc   :  { %v804_v37 = vadd.f32 %v800_v38, %v695_v45  ;;  %v693_v49 = vmul.f32 %v3387_v35, %v689_v4  ;;  %v677_v52 = vpop.f32.mrb[7].mxu1  ;;  %v802_v54 = vmul.f32 %v3401_v36, %v798_v24  ;;  %v786_v59 = vpop.f32.mrb[11].mxu0 }
 0x2bd   :  { %v803_v61 = vadd.f32 %v799_v43, %v694_v46  ;;  %v692_v62 = vmul.f32 %v689_v4, %v677_v52  ;;  %v801_v63 = vmul.f32 %v798_v24, %v786_v59  ;;  %v822_v4 = vrot.slane %v4119_v13, %v4287_v48 }
 0x2be   :  { %v697_v2 = vadd.f32 %v693_v49, %v588_v30  ;;  %v812_v17 = vadd.f32 %v810_v34, %v804_v37 }
 0x2bf   :  { %v811_v15 = vadd.f32 %v810_v34, %v803_v61  ;;  %v696_v16 = vadd.f32 %v692_v62, %v587_v41 }
 0x2c0   :  { %v806_v18 = vadd.f32 %v802_v54, %v697_v2 }
 0x2c1   :  { %v805_v23 = vadd.f32 %v801_v63, %v696_v16  ;;  %3410 = vmatprep.mubr.msk.f32.mxu1 %vm183_vm0, %v811_v15 }
 0x2c2   :  { %3411 = vmatmul.mubr.msk.f32.vlgmr.msra.gmra.mrb[8].mxu1 %vm183_vm0, %v812_v17  ;;  %v814_v20 = vadd.f32 %v810_v34, %v806_v18 }
 0x2c3   :  { %v813_v19 = vadd.f32 %v810_v34, %v805_v23 }
 0x2c5   :  { %3413 = vmatprep.mubr.msk.f32.mxu1 %vm183_vm0, %v813_v19 }
 0x2c6   :  { %3414 = vmatmul.mubr.msk.f32.gmra.mrb[10].mxu1 %vm183_vm0, %v814_v20 }
 0x2c7   :  { %3438 = vmatprep.mubr.msk.f32.mxu1 %vm183_vm0, %v4169_v51 }
 0x395   :  { %v3412_v24 = vpop.f32.mrb[8].mxu1 }
 0x396   :  { %v907_v21 = vadd.f32 %v3412_v24, %v822_v4  ;;  %v901_v22 = vpop.f32.mrb[9].mxu1 }
 0x397   :  { %v902_v29 = vadd.f32 %v901_v22, %v822_v4 }
 0x398   :  { %3839 = vtanh.f32 %v907_v21 }
 0x399   :  { %3841 = vtanh.f32 %v902_v29  ;;  %v3415_v31 = vpop.f32.mrb[10].mxu1 }
 0x39a   :  { %v917_v27 = vadd.f32 %v3415_v31, %v822_v4  ;;  %v911_v28 = vpop.f32.mrb[11].mxu1 }
 0x39b   :  { %v912_v30 = vadd.f32 %v911_v28, %v822_v4 }
 0x39c   :  { %3843 = vtanh.f32 %v917_v27 }
 0x39d   :  { %3845 = vtanh.f32 %v912_v30 }
 0x3a2   :  { %v4304_v32 = vpop.eup %3839 }
 0x3a3   :  { %v4306_v33 = vpop.eup %3841  ;;  %v927_v38 = vsel %vm183_vm0, %v4304_v32, 0.0  ;;  %v941_v39 = vmul.f32 %v4304_v32, %v4304_v32 }
 0x3a4   :  { %928 = vadd.xlane.f32.xlu1 %v927_v38  ;;  %v924_v41 = vsel %vm183_vm0, %v4306_v33, 0.0  ;;  %v940_v42 = vmul.f32 %v4306_v33, %v4306_v33 }
 0x3a5   :  { %925 = vadd.xlane.f32.xlu0 %v924_v41  ;;  %v947_v43 = vsel %vm183_vm0, %v941_v39, 0.0 }
 0x3a6   :  { %v4317_v45 = vpop.eup %3843  ;;  %v944_v46 = vsel %vm183_vm0, %v940_v42, 0.0 }
 0x3a7   :  { %v4320_v34 = vpop.eup %3845  ;;  %v933_v35 = vsel %vm183_vm0, %v4317_v45, 0.0  ;;  %v943_v36 = vmul.f32 %v4317_v45, %v4317_v45 }
 0x3a8   :  { %948 = vadd.xlane.f32.xlu1 %v947_v43  ;;  %v930_v37 = vsel %vm183_vm0, %v4320_v34, 0.0  ;;  %v942_v49 = vmul.f32 %v4320_v34, %v4320_v34  ;;  %v4333_v43 = vsub.s32 5, %v4111_v11 }
 0x3a9   :  { %945 = vadd.xlane.f32.xlu0 %v944_v46  ;;  %v953_v52 = vsel %vm183_vm0, %v943_v36, 0.0  ;;  %v4336_v36 = vsub.s32 6, %v4111_v11 }
 0x3aa   :  { %v950_v54 = vsel %vm183_vm0, %v942_v49, 0.0 }
 0x3ac   :  { %934 = vadd.xlane.f32.xlu1 %v933_v35 }
 0x3ad   :  { %931 = vadd.xlane.f32.xlu0 %v930_v37 }
 0x3b0   :  { %954 = vadd.xlane.f32.xlu1 %v953_v52  ;;  %v987_v52 = vrot.slane %v4119_v13, %v4333_v43 }
 0x3b1   :  { %951 = vadd.xlane.f32.xlu0 %v950_v54 }
 0x431   :  { %v929_v59 = vpop.xlane.xlu1 %928 }
 0x432   :  { %v937_v61 = vmul.f32 0.03125, %v929_v59  ;;  %v926_v62 = vpop.xlane.xlu0 %925 }
 0x433   :  { %v936_v63 = vmul.f32 0.03125, %v926_v62 }
 0x434   :  { %v961_v15 = vmul.f32 %v937_v61, %v937_v61  ;;  %v969_v49 = vsub.f32 %v4304_v32, %v937_v61 }
 0x435   :  { %v949_v2 = vpop.xlane.xlu1 %948  ;;  %v960_v18 = vmul.f32 %v936_v63, %v936_v63  ;;  %v968_v59 = vsub.f32 %v4306_v33, %v936_v63 }
 0x436   :  { %v957_v16 = vmul.f32 0.03125, %v949_v2  ;;  %v946_v17 = vpop.xlane.xlu0 %945  ;;  %v995_v2 = vrot.slane %v4119_v13, %v4336_v36 }
 0x437   :  { %v956_v23 = vmul.f32 0.03125, %v946_v17 }
 0x438   :  { %v965_v19 = vsub.f32 %v957_v16, %v961_v15 }
 0x439   :  { %v964_v20 = vsub.f32 %v956_v23, %v960_v18  ;;  %v935_v4 = vpop.xlane.xlu1 %934 }
 0x43a   :  { %v973_v24 = vadd.f32 1e-05, %v965_v19  ;;  %v939_v21 = vmul.f32 0.03125, %v935_v4  ;;  %v932_v22 = vpop.xlane.xlu0 %931 }
 0x43b   :  { %v972_v29 = vadd.f32 1e-05, %v964_v20  ;;  %v938_v31 = vmul.f32 0.03125, %v932_v22 }
 0x43c   :  { %3847 = vrsqrt.f32 %v973_v24  ;;  %v963_v28 = vmul.f32 %v939_v21, %v939_v21  ;;  %v971_v32 = vsub.f32 %v4317_v45, %v939_v21  ;;  %v1407_v45 = vld [vmem:[#allocation7 + $0x20] sm:$0xff] }
 0x43d   :  { %3849 = vrsqrt.f32 %v972_v29  ;;  %v955_v27 = vpop.xlane.xlu1 %954  ;;  %v962_v39 = vmul.f32 %v938_v31, %v938_v31  ;;  %v970_v4 = vsub.f32 %v4320_v34, %v938_v31  ;;  %v1408_v34 = vld [vmem:[#allocation7 + $0x28] sm:$0xff]  ;;  %v1409_v31 = vld [vmem:[#allocation7 + $0x30] sm:$0xff] }
 0x43e   :  { %v959_v30 = vmul.f32 0.03125, %v955_v27  ;;  %v952_v38 = vpop.xlane.xlu0 %951  ;;  %v3720_v21 = vpack.c.bf16 %v1408_v34, %v1407_v45 }
 0x43f   :  { %v958_v41 = vmul.f32 0.03125, %v952_v38  ;;  %v1410_v38 = vld [vmem:[#allocation7 + $0x38] sm:$0xff] }
 0x440   :  { %v967_v42 = vsub.f32 %v959_v30, %v963_v28 }
 0x441   :  { %v966_v46 = vsub.f32 %v958_v41, %v962_v39  ;;  %v3724_v39 = vpack.c.bf16 %v1410_v38, %v1409_v31  ;;  %v3088_v41 = vld [vmem:[%s4743_s2 + $0x8] sm:$0x1f] }
 0x442   :  { %v975_v35 = vadd.f32 1e-05, %v967_v42  ;;  %v1005_v42 = vrot.slane %v3088_v41, %v4227_v55 }
 0x443   :  { %v974_v37 = vadd.f32 1e-05, %v966_v46  ;;  %v1098_v46 = vrot.slane %v3088_v41, %v4114_v12 }
 0x444   :  { %3851 = vrsqrt.f32 %v975_v35  ;;  %v1195_v35 = vrot.slane %v3088_v41, %v4221_v44 }
 0x445   :  { %3853 = vrsqrt.f32 %v974_v37 }
 0x446   :  { %v3848_v54 = vpop.eup %3847 }
 0x447   :  { %v3850_v62 = vpop.eup %3849  ;;  %v981_v15 = vmul.f32 %v3848_v54, %v969_v49 }
 0x448   :  { %v980_v16 = vmul.f32 %v3850_v62, %v968_v59 }
 0x449   :  { %v989_v17 = vmul.f32 %v987_v52, %v981_v15 }
 0x44a   :  { %v988_v18 = vmul.f32 %v987_v52, %v980_v16 }
 0x44b   :  { %v997_v23 = vadd.f32 %v995_v2, %v989_v17 }
 0x44c   :  { %v4344_v19 = vadd.f32 %v995_v2, %v988_v18 }
 0x44e   :  { %v3852_v61 = vpop.eup %3851  ;;  %v3688_v20 = vpack.c.bf16 %v997_v23, %v4344_v19  ;;  %v1006_v15 = vmul.f32 %v1005_v42, %v4344_v19 }
 0x44f   :  { %v3854_v24 = vpop.eup %3853  ;;  %v983_v33 = vmul.f32 %v3852_v61, %v971_v32 }
 0x450   :  { %v982_v63 = vmul.f32 %v3854_v24, %v970_v4  ;;  %3689 = vmatprep.subr.bf16.mxu0 %v3688_v20  ;;  %3697 = vmatprep.subr.bf16.mxu1 %v3688_v20  ;;  %v1292_v24 = vrot.slane %v3088_v41, %v4283_v40 }
 0x451   :  { %v991_v22 = vmul.f32 %v987_v52, %v983_v33  ;;  %3691 = vmatpush3.bf16.msra.mxu0 %v3688_v20  ;;  %3699 = vmatpush3.bf16.msra.mxu1 %v3688_v20 }
 0x452   :  { %v990_v29 = vmul.f32 %v987_v52, %v982_v63  ;;  %v1007_v52 = vmul.f32 %v1005_v42, %v997_v23 }
 0x453   :  { %v999_v27 = vadd.f32 %v995_v2, %v991_v22 }
 0x454   :  { %v4349_v28 = vadd.f32 %v995_v2, %v990_v29 }
 0x455   :  { %v1009_v61 = vmul.f32 %v1005_v42, %v999_v27 }
 0x456   :  { %v3692_v30 = vpack.c.bf16 %v999_v27, %v4349_v28  ;;  %v1008_v34 = vmul.f32 %v1005_v42, %v4349_v28 }
 0x458   :  { %3693 = vmatprep.subr.bf16.mxu0 %v3692_v30  ;;  %3701 = vmatprep.subr.bf16.mxu1 %v3692_v30 }
 0x459   :  { %3695 = vmatpush3.bf16.msra.mxu0 %v3692_v30  ;;  %3703 = vmatpush3.bf16.msra.mxu1 %v3692_v30 }
 0x45a   :  { %3705 = vmatprep.subr.bf16.mxu0 %v3688_v20  ;;  %3713 = vmatprep.subr.bf16.mxu1 %v3688_v20 }
 0x45c   :  { %3425 = vmatmul.mubr.msk.f32.vlgmr.msra.gmra.mrb[12].mxu0 %vm183_vm0, %v4167_v50  ;;  %3439 = vmatmul.mubr.msk.f32.vlgmr.msra.gmra.mrb[12].mxu1 %vm183_vm0, %v4174_v53 }
 0x45d   :  { %3707 = vmatpush3.bf16.msra.mxu0 %v3688_v20  ;;  %3715 = vmatpush3.bf16.msra.mxu1 %v3688_v20 }
 0x45e   :  { %3709 = vmatprep.subr.bf16.mxu0 %v3692_v30  ;;  %3717 = vmatprep.subr.bf16.mxu1 %v3692_v30 }
 0x45f   :  { %3427 = vmatprep.mubr.msk.f32.mxu0 %vm183_vm0, %v4179_v56  ;;  %3441 = vmatprep.mubr.msk.f32.mxu1 %vm183_vm0, %v4185_v58 }
 0x460   :  { %3428 = vmatmul.mubr.msk.f32.gmra.mrb[14].mxu0 %vm183_vm0, %v4183_v57  ;;  %3442 = vmatmul.mubr.msk.f32.gmra.mrb[14].mxu1 %vm183_vm0, %v4189_v60 }
 0x461   :  { %3711 = vmatpush3.bf16.msra.mxu0 %v3692_v30  ;;  %3719 = vmatpush3.bf16.msra.mxu1 %v3692_v30  ;;  %v1389_v30 = vrot.slane %v3088_v41, %v4287_v48 }
 0x462   :  { %3452 = vmatprep.mubr.msk.f32.mxu0 %vm183_vm0, %v4193_v0  ;;  %3466 = vmatprep.mubr.msk.f32.mxu1 %vm183_vm0, %v4198_v1 }
 0x463   :  { %3721 = vmatprep.subr.bf16.mxu0 %v3720_v21 }
 0x464   :  { %3453 = vmatmul.mubr.msk.f32.vlgmr.msra.gmra.mrb[16].mxu0 %vm183_vm0, %v4201_v3  ;;  %3467 = vmatmul.mubr.msk.f32.vlgmr.msra.gmra.mrb[16].mxu1 %vm183_vm0, %v4204_v5 }
 0x465   :  { %3455 = vmatprep.mubr.msk.f32.mxu0 %vm183_vm0, %v4207_v8  ;;  %3469 = vmatprep.mubr.msk.f32.mxu1 %vm183_vm0, %v4215_v10 }
 0x466   :  { %3723 = vmatpush3.bf16.msra.mxu0 %v3720_v21 }
 0x467   :  { %3725 = vmatprep.subr.bf16.mxu0 %v3724_v39 }
 0x468   :  { %3456 = vmatmul.mubr.msk.f32.gmra.mrb[18].mxu0 %vm183_vm0, %v4213_v9  ;;  %3470 = vmatmul.mubr.msk.f32.gmra.mrb[18].mxu1 %vm183_vm0, %v4218_v14 }
 0x469   :  { %3494 = vmatprep.mubr.msk.f32.mxu1 %vm183_vm0, %v4160_v47 }
 0x46a   :  { %3727 = vmatpush3.bf16.msra.mxu0 %v3724_v39 }
 0x52f   :  { %v3426_v37 = vpop.f32.mrb[12].mxu0  ;;  %v3440_v49 = vpop.f32.mrb[12].mxu1 }
 0x530   :  { %v1100_v54 = vmul.f32 %v3426_v37, %v1098_v46  ;;  %v1076_v59 = vpop.f32.mrb[13].mxu0  ;;  %v1197_v62 = vmul.f32 %v3440_v49, %v1195_v35  ;;  %v1173_v2 = vpop.f32.mrb[13].mxu1  ;;  %v1400_v37 = vsub.s32 7, %v4111_v11 }
 0x531   :  { %v1099_v16 = vmul.f32 %v1098_v46, %v1076_v59  ;;  %v1196_v17 = vmul.f32 %v1195_v35, %v1173_v2 }
 0x532   :  { %v1104_v18 = vadd.f32 %v1100_v54, %v1007_v52  ;;  %v1401_v28 = vrot.slane %v4119_v13, %v1400_v37 }
 0x533   :  { %v1103_v32 = vadd.f32 %v1099_v16, %v1006_v15  ;;  %v3429_v20 = vpop.f32.mrb[14].mxu0  ;;  %v3443_v4 = vpop.f32.mrb[14].mxu1 }
 0x534   :  { %v1201_v33 = vadd.f32 %v1197_v62, %v1104_v18  ;;  %v1102_v63 = vmul.f32 %v3429_v20, %v1098_v46  ;;  %v1086_v22 = vpop.f32.mrb[15].mxu0  ;;  %v1199_v29 = vmul.f32 %v3443_v4, %v1195_v35  ;;  %v1183_v23 = vpop.f32.mrb[15].mxu1 }
 0x535   :  { %v1200_v45 = vadd.f32 %v1196_v17, %v1103_v32  ;;  %v1101_v19 = vmul.f32 %v1098_v46, %v1086_v22  ;;  %v1198_v21 = vmul.f32 %v1195_v35, %v1183_v23 }
 0x536   :  { %v1106_v31 = vadd.f32 %v1102_v63, %v1009_v61 }
 0x537   :  { %v1105_v38 = vadd.f32 %v1101_v19, %v1008_v34  ;;  %v3454_v39 = vpop.f32.mrb[16].mxu0  ;;  %v3468_v27 = vpop.f32.mrb[16].mxu1 }
 0x538   :  { %v1203_v49 = vadd.f32 %v1199_v29, %v1106_v31  ;;  %v1294_v52 = vmul.f32 %v3454_v39, %v1292_v24  ;;  %v1270_v54 = vpop.f32.mrb[17].mxu0  ;;  %v1391_v59 = vmul.f32 %v3468_v27, %v1389_v30  ;;  %v1367_v62 = vpop.f32.mrb[17].mxu1 }
 0x539   :  { %v1202_v2 = vadd.f32 %v1198_v21, %v1105_v38  ;;  %v1293_v15 = vmul.f32 %v1292_v24, %v1270_v54  ;;  %v1390_v16 = vmul.f32 %v1389_v30, %v1367_v62 }
 0x53a   :  { %v1298_v41 = vadd.f32 %v1294_v52, %v1201_v33 }
 0x53b   :  { %v1297_v17 = vadd.f32 %v1293_v15, %v1200_v45  ;;  %v3457_v42 = vpop.f32.mrb[18].mxu0  ;;  %v3471_v46 = vpop.f32.mrb[18].mxu1 }
 0x53c   :  { %v1395_v35 = vadd.f32 %v1391_v59, %v1298_v41  ;;  %v1296_v18 = vmul.f32 %v3457_v42, %v1292_v24  ;;  %v1280_v32 = vpop.f32.mrb[19].mxu0  ;;  %v1393_v61 = vmul.f32 %v3471_v46, %v1389_v30  ;;  %v1377_v20 = vpop.f32.mrb[19].mxu1 }
 0x53d   :  { %v1394_v4 = vadd.f32 %v1390_v16, %v1297_v17  ;;  %v1295_v63 = vmul.f32 %v1292_v24, %v1280_v32  ;;  %v1392_v22 = vmul.f32 %v1389_v30, %v1377_v20  ;;  %v4405_v24 = vld [vmem:[%s4745_s4 + $0x8] sm:$0xff] }
 0x53e   :  { %v1300_v29 = vadd.f32 %v1296_v18, %v1203_v49  ;;  %v1403_v19 = vadd.f32 %v1401_v28, %v1395_v35  ;;  %v1414_v30 = vrot.slane %v4405_v24, %v4114_v12 }
 0x53f   :  { %v1402_v23 = vadd.f32 %v1401_v28, %v1394_v4  ;;  %v1299_v34 = vadd.f32 %v1295_v63, %v1202_v2 }
 0x540   :  { %v1397_v33 = vadd.f32 %v1393_v61, %v1300_v29 }
 0x541   :  { %v1396_v45 = vadd.f32 %v1392_v22, %v1299_v34  ;;  %3480 = vmatprep.mubr.msk.f32.mxu0 %vm183_vm0, %v1402_v23 }
 0x542   :  { %3481 = vmatmul.mubr.msk.f32.vlgmr.msra.gmra.mrb[20].mxu0 %vm183_vm0, %v1403_v19  ;;  %v1405_v21 = vadd.f32 %v1401_v28, %v1397_v33 }
 0x543   :  { %v1404_v13 = vadd.f32 %v1401_v28, %v1396_v45 }
 0x545   :  { %3483 = vmatprep.mubr.msk.f32.mxu0 %vm183_vm0, %v1404_v13 }
 0x546   :  { %3484 = vmatmul.mubr.msk.f32.gmra.mrb[22].mxu0 %vm183_vm0, %v1405_v21 }
 0x547   :  { %3508 = vmatprep.mubr.msk.f32.mxu0 %vm183_vm0, %v4169_v51 }
 0x615   :  { %v3482_v31 = vpop.f32.mrb[20].mxu0 }
 0x616   :  { %v1499_v38 = vadd.f32 %v3482_v31, %v1414_v30  ;;  %v1493_v39 = vpop.f32.mrb[21].mxu0 }
 0x617   :  { %v1494_v27 = vadd.f32 %v1493_v39, %v1414_v30 }
 0x618   :  { %3855 = vtanh.f32 %v1499_v38 }
 0x619   :  { %3857 = vtanh.f32 %v1494_v27  ;;  %v3485_v49 = vpop.f32.mrb[22].mxu0 }
 0x61a   :  { %v1509_v52 = vadd.f32 %v3485_v49, %v1414_v30  ;;  %v1503_v54 = vpop.f32.mrb[23].mxu0 }
 0x61b   :  { %v1504_v59 = vadd.f32 %v1503_v54, %v1414_v30 }
 0x61c   :  { %3859 = vtanh.f32 %v1509_v52 }
 0x61d   :  { %3861 = vtanh.f32 %v1504_v59 }
 0x622   :  { %v3856_v62 = vpop.eup %3855 }
 0x623   :  { %v4409_v2 = vpop.eup %3857  ;;  %v1519_v15 = vsel %vm183_vm0, %v3856_v62, 0.0  ;;  %v1533_v16 = vmul.f32 %v3856_v62, %v3856_v62 }
 0x624   :  { %1520 = vadd.xlane.f32.xlu1 %v1519_v15  ;;  %v1516_v41 = vsel %vm183_vm0, %v4409_v2, 0.0  ;;  %v1532_v17 = vmul.f32 %v4409_v2, %v4409_v2 }
 0x625   :  { %1517 = vadd.xlane.f32.xlu0 %v1516_v41  ;;  %v1539_v28 = vsel %vm183_vm0, %v1533_v16, 0.0 }
 0x626   :  { %v4417_v42 = vpop.eup %3859  ;;  %v1536_v46 = vsel %vm183_vm0, %v1532_v17, 0.0 }
 0x627   :  { %v4420_v35 = vpop.eup %3861  ;;  %v1525_v18 = vsel %vm183_vm0, %v4417_v42, 0.0  ;;  %v1535_v32 = vmul.f32 %v4417_v42, %v4417_v42 }
 0x628   :  { %1540 = vadd.xlane.f32.xlu1 %v1539_v28  ;;  %v1522_v61 = vsel %vm183_vm0, %v4420_v35, 0.0  ;;  %v1534_v20 = vmul.f32 %v4420_v35, %v4420_v35 }
 0x629   :  { %1537 = vadd.xlane.f32.xlu0 %v1536_v46  ;;  %v1545_v4 = vsel %vm183_vm0, %v1535_v32, 0.0 }
 0x62a   :  { %v1542_v63 = vsel %vm183_vm0, %v1534_v20, 0.0 }
 0x62c   :  { %1526 = vadd.xlane.f32.xlu1 %v1525_v18 }
 0x62d   :  { %1523 = vadd.xlane.f32.xlu0 %v1522_v61 }
 0x630   :  { %1546 = vadd.xlane.f32.xlu1 %v1545_v4 }
 0x631   :  { %1543 = vadd.xlane.f32.xlu0 %v1542_v63  ;;  %v1579_v63 = vrot.slane %v4405_v24, %v4221_v44 }
 0x6b1   :  { %v1521_v22 = vpop.xlane.xlu1 %1520 }
 0x6b2   :  { %v1529_v29 = vmul.f32 0.03125, %v1521_v22  ;;  %v1518_v23 = vpop.xlane.xlu0 %1517 }
 0x6b3   :  { %v1528_v34 = vmul.f32 0.03125, %v1518_v23 }
 0x6b4   :  { %v1553_v33 = vmul.f32 %v1529_v29, %v1529_v29  ;;  %v1561_v4 = vsub.f32 %v3856_v62, %v1529_v29 }
 0x6b5   :  { %v1541_v19 = vpop.xlane.xlu1 %1540  ;;  %v1552_v21 = vmul.f32 %v1528_v34, %v1528_v34  ;;  %v1560_v23 = vsub.f32 %v4409_v2, %v1528_v34 }
 0x6b6   :  { %v1549_v45 = vmul.f32 0.03125, %v1541_v19  ;;  %v1538_v13 = vpop.xlane.xlu0 %1537 }
 0x6b7   :  { %v1548_v30 = vmul.f32 0.03125, %v1538_v13 }
 0x6b8   :  { %v1557_v31 = vsub.f32 %v1549_v45, %v1553_v33  ;;  %v1587_v45 = vrot.slane %v4405_v24, %v4227_v55 }
 0x6b9   :  { %v1556_v38 = vsub.f32 %v1548_v30, %v1552_v21  ;;  %v1527_v39 = vpop.xlane.xlu1 %1526 }
 0x6ba   :  { %v1565_v27 = vadd.f32 1e-05, %v1557_v31  ;;  %v1531_v49 = vmul.f32 0.03125, %v1527_v39  ;;  %v1524_v52 = vpop.xlane.xlu0 %1523 }
 0x6bb   :  { %v1564_v54 = vadd.f32 1e-05, %v1556_v38  ;;  %v1530_v59 = vmul.f32 0.03125, %v1524_v52 }
 0x6bc   :  { %3863 = vrsqrt.f32 %v1565_v27  ;;  %v1555_v16 = vmul.f32 %v1531_v49, %v1531_v49  ;;  %v1563_v39 = vsub.f32 %v4417_v42, %v1531_v49 }
 0x6bd   :  { %3865 = vrsqrt.f32 %v1564_v54  ;;  %v1547_v15 = vpop.xlane.xlu1 %1546  ;;  %v1554_v28 = vmul.f32 %v1530_v59, %v1530_v59  ;;  %v1562_v27 = vsub.f32 %v4420_v35, %v1530_v59 }
 0x6be   :  { %v1551_v41 = vmul.f32 0.03125, %v1547_v15  ;;  %v1544_v17 = vpop.xlane.xlu0 %1543 }
 0x6bf   :  { %v1550_v46 = vmul.f32 0.03125, %v1544_v17 }
 0x6c0   :  { %v1559_v18 = vsub.f32 %v1551_v41, %v1555_v16 }
 0x6c1   :  { %v1558_v32 = vsub.f32 %v1550_v46, %v1554_v28 }
 0x6c2   :  { %v1567_v61 = vadd.f32 1e-05, %v1559_v18 }
 0x6c3   :  { %v1566_v20 = vadd.f32 1e-05, %v1558_v32 }
 0x6c4   :  { %3867 = vrsqrt.f32 %v1567_v61 }
 0x6c5   :  { %3869 = vrsqrt.f32 %v1566_v20 }
 0x6c6   :  { %v3864_v22 = vpop.eup %3863 }
 0x6c7   :  { %v3866_v19 = vpop.eup %3865  ;;  %v1573_v33 = vmul.f32 %v3864_v22, %v1561_v4 }
 0x6c8   :  { %v1572_v13 = vmul.f32 %v3866_v19, %v1560_v23 }
 0x6c9   :  { %v1581_v21 = vmul.f32 %v1579_v63, %v1573_v33 }
 0x6ca   :  { %v1580_v30 = vmul.f32 %v1579_v63, %v1572_v13 }
 0x6cb   :  { %v1589_v31 = vadd.f32 %v1587_v45, %v1581_v21 }
 0x6cc   :  { %v1588_v38 = vadd.f32 %v1587_v45, %v1580_v30 }
 0x6cd   :  { %v4439_v62 = vadd.f32 %v1589_v31, %v4232_v6 }
 0x6ce   :  { %v3868_v29 = vpop.eup %3867  ;;  %v4443_v2 = vadd.f32 %v1588_v38, %v4234_v7 }
 0x6cf   :  { %v3870_v34 = vpop.eup %3869  ;;  %v1599_v52 = vsel %vm183_vm0, %v4439_v62, 0.0  ;;  %v1613_v54 = vmul.f32 %v4439_v62, %v4439_v62  ;;  %v1575_v15 = vmul.f32 %v3868_v29, %v1563_v39 }
 0x6d0   :  { %1600 = vadd.xlane.f32.xlu1 %v1599_v52  ;;  %v1596_v42 = vsel %vm183_vm0, %v4443_v2, 0.0  ;;  %v1612_v6 = vmul.f32 %v4443_v2, %v4443_v2  ;;  %v1574_v49 = vmul.f32 %v3870_v34, %v1562_v27 }
 0x6d1   :  { %1597 = vadd.xlane.f32.xlu0 %v1596_v42  ;;  %v1583_v35 = vmul.f32 %v1579_v63, %v1575_v15  ;;  %v1619_v59 = vsel %vm183_vm0, %v1613_v54, 0.0 }
 0x6d2   :  { %v1582_v7 = vmul.f32 %v1579_v63, %v1574_v49  ;;  %v1616_v41 = vsel %vm183_vm0, %v1612_v6, 0.0 }
 0x6d3   :  { %v1591_v16 = vadd.f32 %v1587_v45, %v1583_v35 }
 0x6d4   :  { %1620 = vadd.xlane.f32.xlu1 %v1619_v59  ;;  %v1590_v17 = vadd.f32 %v1587_v45, %v1582_v7 }
 0x6d5   :  { %1617 = vadd.xlane.f32.xlu0 %v1616_v41  ;;  %v4456_v28 = vadd.f32 %v1591_v16, %v4242_v26  ;;  %v4474_v41 = vld [vmem:[%s4745_s4 + $0x10] sm:$0x7f] }
 0x6d6   :  { %v4459_v46 = vadd.f32 %v1590_v17, %v4240_v25 }
 0x6d7   :  { %v1605_v18 = vsel %vm183_vm0, %v4456_v28, 0.0  ;;  %v1615_v32 = vmul.f32 %v4456_v28, %v4456_v28 }
 0x6d8   :  { %1606 = vadd.xlane.f32.xlu1 %v1605_v18  ;;  %v1602_v61 = vsel %vm183_vm0, %v4459_v46, 0.0  ;;  %v1614_v20 = vmul.f32 %v4459_v46, %v4459_v46 }
 0x6d9   :  { %1603 = vadd.xlane.f32.xlu0 %v1602_v61  ;;  %v1625_v26 = vsel %vm183_vm0, %v1615_v32, 0.0  ;;  %v1659_v61 = vrot.slane %v4474_v41, %v4283_v40 }
 0x6da   :  { %v1622_v25 = vsel %vm183_vm0, %v1614_v20, 0.0 }
 0x6dc   :  { %1626 = vadd.xlane.f32.xlu1 %v1625_v26 }
 0x6dd   :  { %1623 = vadd.xlane.f32.xlu0 %v1622_v25 }
 0x75d   :  { %v1601_v4 = vpop.xlane.xlu1 %1600 }
 0x75e   :  { %v1609_v63 = vmul.f32 0.03125, %v1601_v4  ;;  %v1598_v22 = vpop.xlane.xlu0 %1597  ;;  %v1667_v4 = vrot.slane %v4474_v41, %v4287_v48 }
 0x75f   :  { %v1608_v23 = vmul.f32 0.03125, %v1598_v22 }
 0x760   :  { %v1633_v33 = vmul.f32 %v1609_v63, %v1609_v63  ;;  %v1641_v32 = vsub.f32 %v4439_v62, %v1609_v63 }
 0x761   :  { %v1621_v19 = vpop.xlane.xlu1 %1620  ;;  %v1632_v21 = vmul.f32 %v1608_v23, %v1608_v23  ;;  %v1640_v26 = vsub.f32 %v4443_v2, %v1608_v23 }
 0x762   :  { %v1629_v45 = vmul.f32 0.03125, %v1621_v19  ;;  %v1618_v13 = vpop.xlane.xlu0 %1617 }
 0x763   :  { %v1628_v30 = vmul.f32 0.03125, %v1618_v13 }
 0x764   :  { %v1637_v31 = vsub.f32 %v1629_v45, %v1633_v33 }
 0x765   :  { %v1636_v38 = vsub.f32 %v1628_v30, %v1632_v21  ;;  %v1607_v39 = vpop.xlane.xlu1 %1606 }
 0x766   :  { %v1645_v29 = vadd.f32 1e-05, %v1637_v31  ;;  %v1611_v27 = vmul.f32 0.03125, %v1607_v39  ;;  %v1604_v34 = vpop.xlane.xlu0 %1603 }
 0x767   :  { %v1644_v52 = vadd.f32 1e-05, %v1636_v38  ;;  %v1610_v54 = vmul.f32 0.03125, %v1604_v34 }
 0x768   :  { %3871 = vrsqrt.f32 %v1645_v29  ;;  %v1635_v42 = vmul.f32 %v1611_v27, %v1611_v27  ;;  %v1643_v62 = vsub.f32 %v4456_v28, %v1611_v27  ;;  %v2080_v27 = vld [vmem:[#allocation7 + $0x48] sm:$0xff] }
 0x769   :  { %3873 = vrsqrt.f32 %v1644_v52  ;;  %v1627_v15 = vpop.xlane.xlu1 %1626  ;;  %v1634_v35 = vmul.f32 %v1610_v54, %v1610_v54  ;;  %v1642_v2 = vsub.f32 %v4459_v46, %v1610_v54  ;;  %v2079_v46 = vld [vmem:[#allocation7 + $0x40] sm:$0xff] }
 0x76a   :  { %v1631_v6 = vmul.f32 0.03125, %v1627_v15  ;;  %v1624_v49 = vpop.xlane.xlu0 %1623  ;;  %v3760_v54 = vpack.c.bf16 %v2080_v27, %v2079_v46  ;;  %v2081_v15 = vld [vmem:[#allocation7 + $0x50] sm:$0xff] }
 0x76b   :  { %v1630_v7 = vmul.f32 0.03125, %v1624_v49  ;;  %v3109_v49 = vld [vmem:[%s4743_s2 + $0x10] sm:$0x1f] }
 0x76c   :  { %v1639_v59 = vsub.f32 %v1631_v6, %v1635_v42  ;;  %v2082_v42 = vld [vmem:[#allocation7 + $0x58] sm:$0xff] }
 0x76d   :  { %v1638_v16 = vsub.f32 %v1630_v7, %v1634_v35  ;;  %v3764_v6 = vpack.c.bf16 %v2082_v42, %v2081_v15  ;;  %v1677_v35 = vrot.slane %v3109_v49, %v4227_v55  ;;  %v1770_v7 = vrot.slane %v3109_v49, %v4114_v12 }
 0x76e   :  { %v1647_v17 = vadd.f32 1e-05, %v1639_v59 }
 0x76f   :  { %v1646_v18 = vadd.f32 1e-05, %v1638_v16 }
 0x770   :  { %3875 = vrsqrt.f32 %v1647_v17 }
 0x771   :  { %3877 = vrsqrt.f32 %v1646_v18 }
 0x772   :  { %v3872_v20 = vpop.eup %3871 }
 0x773   :  { %v3874_v25 = vpop.eup %3873  ;;  %v1653_v22 = vmul.f32 %v3872_v20, %v1641_v32 }
 0x774   :  { %v1652_v19 = vmul.f32 %v3874_v25, %v1640_v26 }
 0x775   :  { %v1661_v33 = vmul.f32 %v1659_v61, %v1653_v22 }
 0x776   :  { %v1660_v45 = vmul.f32 %v1659_v61, %v1652_v19 }
 0x777   :  { %v4482_v13 = vadd.f32 %v1667_v4, %v1661_v33 }
 0x778   :  { %v4484_v21 = vadd.f32 %v1667_v4, %v1660_v45 }
 0x779   :  { %v1679_v17 = vmul.f32 %v1677_v35, %v4482_v13 }
 0x77a   :  { %v3876_v63 = vpop.eup %3875  ;;  %v3728_v30 = vpack.c.bf16 %v4482_v13, %v4484_v21  ;;  %v1678_v26 = vmul.f32 %v1677_v35, %v4484_v21 }
 0x77b   :  { %v3878_v23 = vpop.eup %3877  ;;  %v1655_v31 = vmul.f32 %v3876_v63, %v1643_v62  ;;  %v1964_v63 = vrot.slane %v3109_v49, %v4283_v40 }
 0x77c   :  { %v1654_v38 = vmul.f32 %v3878_v23, %v1642_v2  ;;  %3729 = vmatprep.subr.bf16.mxu1 %v3728_v30  ;;  %3737 = vmatprep.subr.bf16.mxu0 %v3728_v30 }
 0x77d   :  { %v1663_v39 = vmul.f32 %v1659_v61, %v1655_v31  ;;  %3731 = vmatpush3.bf16.msra.mxu1 %v3728_v30  ;;  %3739 = vmatpush3.bf16.msra.mxu0 %v3728_v30 }
 0x77e   :  { %v1662_v29 = vmul.f32 %v1659_v61, %v1654_v38 }
 0x77f   :  { %v4490_v34 = vadd.f32 %v1667_v4, %v1663_v39  ;;  %v2061_v39 = vrot.slane %v3109_v49, %v4287_v48 }
 0x780   :  { %v4492_v52 = vadd.f32 %v1667_v4, %v1662_v29 }
 0x781   :  { %v1681_v33 = vmul.f32 %v1677_v35, %v4490_v34 }
 0x782   :  { %v3732_v28 = vpack.c.bf16 %v4490_v34, %v4492_v52 }
 0x784   :  { %3733 = vmatprep.subr.bf16.mxu1 %v3732_v28  ;;  %3741 = vmatprep.subr.bf16.mxu0 %v3732_v28 }
 0x785   :  { %3735 = vmatpush3.bf16.msra.mxu1 %v3732_v28  ;;  %3743 = vmatpush3.bf16.msra.mxu0 %v3732_v28 }
 0x786   :  { %3745 = vmatprep.subr.bf16.mxu1 %v3728_v30  ;;  %3753 = vmatprep.subr.bf16.mxu0 %v3728_v30 }
 0x788   :  { %3495 = vmatmul.mubr.msk.f32.vlgmr.msra.gmra.mrb[20].mxu1 %vm183_vm0, %v4167_v50  ;;  %3509 = vmatmul.mubr.msk.f32.vlgmr.msra.gmra.mrb[24].mxu0 %vm183_vm0, %v4174_v53 }
 0x789   :  { %3747 = vmatpush3.bf16.msra.mxu1 %v3728_v30  ;;  %3755 = vmatpush3.bf16.msra.mxu0 %v3728_v30 }
 0x78a   :  { %3749 = vmatprep.subr.bf16.mxu1 %v3732_v28  ;;  %3757 = vmatprep.subr.bf16.mxu0 %v3732_v28 }
 0x78b   :  { %3497 = vmatprep.mubr.msk.f32.mxu1 %vm183_vm0, %v4179_v56  ;;  %3511 = vmatprep.mubr.msk.f32.mxu0 %vm183_vm0, %v4185_v58 }
 0x78c   :  { %3498 = vmatmul.mubr.msk.f32.gmra.mrb[22].mxu1 %vm183_vm0, %v4183_v57  ;;  %3512 = vmatmul.mubr.msk.f32.gmra.mrb[26].mxu0 %vm183_vm0, %v4189_v60 }
 0x78d   :  { %3751 = vmatpush3.bf16.msra.mxu1 %v3732_v28  ;;  %3759 = vmatpush3.bf16.msra.mxu0 %v3732_v28  ;;  %v1680_v28 = vmul.f32 %v1677_v35, %v4492_v52 }
 0x78e   :  { %3522 = vmatprep.mubr.msk.f32.mxu1 %vm183_vm0, %v4193_v0  ;;  %3536 = vmatprep.mubr.msk.f32.mxu0 %vm183_vm0, %v4198_v1 }
 0x78f   :  { %3761 = vmatprep.subr.bf16.mxu1 %v3760_v54 }
 0x790   :  { %3523 = vmatmul.mubr.msk.f32.vlgmr.msra.gmra.mrb[24].mxu1 %vm183_vm0, %v4201_v3  ;;  %3537 = vmatmul.mubr.msk.f32.vlgmr.msra.gmra.mrb[28].mxu0 %vm183_vm0, %v4204_v5 }
 0x791   :  { %3525 = vmatprep.mubr.msk.f32.mxu1 %vm183_vm0, %v4207_v8  ;;  %3539 = vmatprep.mubr.msk.f32.mxu0 %vm183_vm0, %v4215_v10 }
 0x792   :  { %3763 = vmatpush3.bf16.msra.mxu1 %v3760_v54 }
 0x793   :  { %3765 = vmatprep.subr.bf16.mxu1 %v3764_v6 }
 0x794   :  { %3526 = vmatmul.mubr.msk.f32.gmra.mrb[26].mxu1 %vm183_vm0, %v4213_v9  ;;  %3540 = vmatmul.mubr.msk.f32.gmra.mrb[30].mxu0 %vm183_vm0, %v4218_v14 }
 0x795   :  { %3564 = vmatprep.mubr.msk.f32.mxu0 %vm183_vm0, %v4160_v47  ;;  %v1867_v47 = vrot.slane %v3109_v49, %v4221_v44  ;;  %v2073_v49 = vrot.slane %v4405_v24, %v4283_v40 }
 0x796   :  { %3767 = vmatpush3.bf16.msra.mxu1 %v3764_v6 }
 0x85b   :  { %v3496_v59 = vpop.f32.mrb[20].mxu1  ;;  %v3510_v16 = vpop.f32.mrb[24].mxu0 }
 0x85c   :  { %v1772_v18 = vmul.f32 %v3496_v59, %v1770_v7  ;;  %v1748_v32 = vpop.f32.mrb[21].mxu1  ;;  %v1869_v61 = vmul.f32 %v3510_v16, %v1867_v47  ;;  %v1845_v20 = vpop.f32.mrb[25].mxu0 }
 0x85d   :  { %v1771_v25 = vmul.f32 %v1770_v7, %v1748_v32  ;;  %v1868_v4 = vmul.f32 %v1867_v47, %v1845_v20 }
 0x85e   :  { %v1776_v22 = vadd.f32 %v1772_v18, %v1679_v17 }
 0x85f   :  { %v1775_v19 = vadd.f32 %v1771_v25, %v1678_v26  ;;  %v3499_v45 = vpop.f32.mrb[22].mxu1  ;;  %v3513_v62 = vpop.f32.mrb[26].mxu0 }
 0x860   :  { %v1873_v30 = vadd.f32 %v1869_v61, %v1776_v22  ;;  %v1774_v2 = vmul.f32 %v3499_v45, %v1770_v7  ;;  %v1758_v23 = vpop.f32.mrb[23].mxu1  ;;  %v1871_v31 = vmul.f32 %v3513_v62, %v1867_v47  ;;  %v1855_v38 = vpop.f32.mrb[27].mxu0 }
 0x861   :  { %v1872_v29 = vadd.f32 %v1868_v4, %v1775_v19  ;;  %v1773_v46 = vmul.f32 %v1770_v7, %v1758_v23  ;;  %v1870_v27 = vmul.f32 %v1867_v47, %v1855_v38 }
 0x862   :  { %v1778_v54 = vadd.f32 %v1774_v2, %v1681_v33 }
 0x863   :  { %v1777_v15 = vadd.f32 %v1773_v46, %v1680_v28  ;;  %v3524_v42 = vpop.f32.mrb[24].mxu1  ;;  %v3538_v6 = vpop.f32.mrb[28].mxu0 }
 0x864   :  { %v1875_v59 = vadd.f32 %v1871_v31, %v1778_v54  ;;  %v1966_v16 = vmul.f32 %v3524_v42, %v1964_v63  ;;  %v1942_v17 = vpop.f32.mrb[25].mxu1  ;;  %v2063_v18 = vmul.f32 %v3538_v6, %v2061_v39  ;;  %v2039_v32 = vpop.f32.mrb[29].mxu0 }
 0x865   :  { %v1874_v61 = vadd.f32 %v1870_v27, %v1777_v15  ;;  %v1965_v20 = vmul.f32 %v1964_v63, %v1942_v17  ;;  %v2062_v26 = vmul.f32 %v2061_v39, %v2039_v32 }
 0x866   :  { %v1970_v25 = vadd.f32 %v1966_v16, %v1873_v30 }
 0x867   :  { %v1969_v22 = vadd.f32 %v1965_v20, %v1872_v29  ;;  %v3527_v35 = vpop.f32.mrb[26].mxu1  ;;  %v3541_v7 = vpop.f32.mrb[30].mxu0 }
 0x868   :  { %v2067_v47 = vadd.f32 %v2063_v18, %v1970_v25  ;;  %v1968_v4 = vmul.f32 %v3527_v35, %v1964_v63  ;;  %v1952_v19 = vpop.f32.mrb[27].mxu1  ;;  %v2065_v33 = vmul.f32 %v3541_v7, %v2061_v39  ;;  %v2049_v45 = vpop.f32.mrb[31].mxu0 }
 0x869   :  { %v2066_v62 = vadd.f32 %v2062_v26, %v1969_v22  ;;  %v1967_v2 = vmul.f32 %v1964_v63, %v1952_v19  ;;  %v2064_v23 = vmul.f32 %v2061_v39, %v2049_v45  ;;  %v2086_v63 = vrot.slane %v4405_v24, %v4287_v48 }
 0x86a   :  { %v1972_v31 = vadd.f32 %v1968_v4, %v1875_v59  ;;  %v2075_v46 = vadd.f32 %v2073_v49, %v2067_v47 }
 0x86b   :  { %v2074_v38 = vadd.f32 %v2073_v49, %v2066_v62  ;;  %v1971_v28 = vadd.f32 %v1967_v2, %v1874_v61 }
 0x86c   :  { %v2069_v27 = vadd.f32 %v2065_v33, %v1972_v31 }
 0x86d   :  { %v2068_v30 = vadd.f32 %v2064_v23, %v1971_v28  ;;  %3550 = vmatprep.mubr.msk.f32.mxu1 %vm183_vm0, %v2074_v38 }
 0x86e   :  { %3551 = vmatmul.mubr.msk.f32.vlgmr.msra.gmra.mrb[28].mxu1 %vm183_vm0, %v2075_v46  ;;  %v2077_v54 = vadd.f32 %v2073_v49, %v2069_v27 }
 0x86f   :  { %v2076_v29 = vadd.f32 %v2073_v49, %v2068_v30 }
 0x871   :  { %3553 = vmatprep.mubr.msk.f32.mxu1 %vm183_vm0, %v2076_v29 }
 0x872   :  { %3554 = vmatmul.mubr.msk.f32.gmra.mrb[30].mxu1 %vm183_vm0, %v2077_v54 }
 0x873   :  { %3578 = vmatprep.mubr.msk.f32.mxu1 %vm183_vm0, %v4169_v51 }
 0x941   :  { %v3552_v39 = vpop.f32.mrb[28].mxu1 }
 0x942   :  { %v2171_v15 = vadd.f32 %v3552_v39, %v2086_v63  ;;  %v2165_v42 = vpop.f32.mrb[29].mxu1 }
 0x943   :  { %v2166_v6 = vadd.f32 %v2165_v42, %v2086_v63 }
 0x944   :  { %3879 = vtanh.f32 %v2171_v15 }
 0x945   :  { %3881 = vtanh.f32 %v2166_v6  ;;  %v3555_v59 = vpop.f32.mrb[30].mxu1 }
 0x946   :  { %v2181_v16 = vadd.f32 %v3555_v59, %v2086_v63  ;;  %v2175_v17 = vpop.f32.mrb[31].mxu1 }
 0x947   :  { %v2176_v18 = vadd.f32 %v2175_v17, %v2086_v63 }
 0x948   :  { %3883 = vtanh.f32 %v2181_v16 }
 0x949   :  { %3885 = vtanh.f32 %v2176_v18 }
 0x94e   :  { %v4548_v32 = vpop.eup %3879 }
 0x94f   :  { %v4550_v61 = vpop.eup %3881  ;;  %v2191_v51 = vsel %vm183_vm0, %v4548_v32, 0.0  ;;  %v2205_v20 = vmul.f32 %v4548_v32, %v4548_v32 }
 0x950   :  { %2192 = vadd.xlane.f32.xlu1 %v2191_v51  ;;  %v2188_v26 = vsel %vm183_vm0, %v4550_v61, 0.0  ;;  %v2204_v25 = vmul.f32 %v4550_v61, %v4550_v61 }
 0x951   :  { %2189 = vadd.xlane.f32.xlu0 %v2188_v26  ;;  %v2211_v22 = vsel %vm183_vm0, %v2205_v20, 0.0 }
 0x952   :  { %v4561_v49 = vpop.eup %3883  ;;  %v2208_v35 = vsel %vm183_vm0, %v2204_v25, 0.0 }
 0x953   :  { %v4564_v7 = vpop.eup %3885  ;;  %v2197_v47 = vsel %vm183_vm0, %v4561_v49, 0.0  ;;  %v2207_v4 = vmul.f32 %v4561_v49, %v4561_v49 }
 0x954   :  { %2212 = vadd.xlane.f32.xlu1 %v2211_v22  ;;  %v2194_v19 = vsel %vm183_vm0, %v4564_v7, 0.0  ;;  %v2206_v33 = vmul.f32 %v4564_v7, %v4564_v7 }
 0x955   :  { %2209 = vadd.xlane.f32.xlu0 %v2208_v35  ;;  %v2217_v45 = vsel %vm183_vm0, %v2207_v4, 0.0 }
 0x956   :  { %v2214_v62 = vsel %vm183_vm0, %v2206_v33, 0.0 }
 0x958   :  { %2198 = vadd.xlane.f32.xlu1 %v2197_v47 }
 0x959   :  { %2195 = vadd.xlane.f32.xlu0 %v2194_v19 }
 0x95c   :  { %2218 = vadd.xlane.f32.xlu1 %v2217_v45  ;;  %v2251_v45 = vrot.slane %v4405_v24, %v4333_v43 }
 0x95d   :  { %2215 = vadd.xlane.f32.xlu0 %v2214_v62 }
 0x9dd   :  { %v2193_v2 = vpop.xlane.xlu1 %2192 }
 0x9de   :  { %v2201_v23 = vmul.f32 0.03125, %v2193_v2  ;;  %v2190_v31 = vpop.xlane.xlu0 %2189 }
 0x9df   :  { %v2200_v38 = vmul.f32 0.03125, %v2190_v31 }
 0x9e0   :  { %v2225_v46 = vmul.f32 %v2201_v23, %v2201_v23  ;;  %v2233_v33 = vsub.f32 %v4548_v32, %v2201_v23 }
 0x9e1   :  { %v2213_v28 = vpop.xlane.xlu1 %2212  ;;  %v2224_v29 = vmul.f32 %v2200_v38, %v2200_v38  ;;  %v2232_v2 = vsub.f32 %v4550_v61, %v2200_v38 }
 0x9e2   :  { %v2221_v27 = vmul.f32 0.03125, %v2213_v28  ;;  %v2210_v30 = vpop.xlane.xlu0 %2209  ;;  %v2259_v28 = vrot.slane %v4405_v24, %v4336_v36 }
 0x9e3   :  { %v2220_v54 = vmul.f32 0.03125, %v2210_v30 }
 0x9e4   :  { %v2229_v63 = vsub.f32 %v2221_v27, %v2225_v46 }
 0x9e5   :  { %v2228_v39 = vsub.f32 %v2220_v54, %v2224_v29  ;;  %v2199_v15 = vpop.xlane.xlu1 %2198 }
 0x9e6   :  { %v2237_v42 = vadd.f32 1e-05, %v2229_v63  ;;  %v2203_v6 = vmul.f32 0.03125, %v2199_v15  ;;  %v2196_v59 = vpop.xlane.xlu0 %2195 }
 0x9e7   :  { %v2236_v16 = vadd.f32 1e-05, %v2228_v39  ;;  %v2202_v17 = vmul.f32 0.03125, %v2196_v59 }
 0x9e8   :  { %3887 = vrsqrt.f32 %v2237_v42  ;;  %v2227_v51 = vmul.f32 %v2203_v6, %v2203_v6  ;;  %v2235_v32 = vsub.f32 %v4561_v49, %v2203_v6 }
 0x9e9   :  { %3889 = vrsqrt.f32 %v2236_v16  ;;  %v2219_v18 = vpop.xlane.xlu1 %2218  ;;  %v2226_v25 = vmul.f32 %v2202_v17, %v2202_v17  ;;  %v2234_v15 = vsub.f32 %v4564_v7, %v2202_v17 }
 0x9ea   :  { %v2223_v20 = vmul.f32 0.03125, %v2219_v18  ;;  %v2216_v26 = vpop.xlane.xlu0 %2215 }
 0x9eb   :  { %v2222_v22 = vmul.f32 0.03125, %v2216_v26 }
 0x9ec   :  { %v2231_v35 = vsub.f32 %v2223_v20, %v2227_v51 }
 0x9ed   :  { %v2230_v47 = vsub.f32 %v2222_v22, %v2226_v25 }
 0x9ee   :  { %v2239_v4 = vadd.f32 1e-05, %v2231_v35 }
 0x9ef   :  { %v2238_v19 = vadd.f32 1e-05, %v2230_v47 }
 0x9f0   :  { %3891 = vrsqrt.f32 %v2239_v4 }
 0x9f1   :  { %3893 = vrsqrt.f32 %v2238_v19 }
 0x9f2   :  { %v3888_v62 = vpop.eup %3887 }
 0x9f3   :  { %v3890_v31 = vpop.eup %3889  ;;  %v2245_v46 = vmul.f32 %v3888_v62, %v2233_v33 }
 0x9f4   :  { %v2244_v27 = vmul.f32 %v3890_v31, %v2232_v2 }
 0x9f5   :  { %v2253_v30 = vmul.f32 %v2251_v45, %v2245_v46 }
 0x9f6   :  { %v2252_v29 = vmul.f32 %v2251_v45, %v2244_v27 }
 0x9f7   :  { %v2261_v54 = vadd.f32 %v2259_v28, %v2253_v30 }
 0x9f8   :  { %v4582_v63 = vadd.f32 %v2259_v28, %v2252_v29 }
 0x9fa   :  { %v3892_v23 = vpop.eup %3891  ;;  %v3768_v39 = vpack.c.bf16 %v2261_v54, %v4582_v63 }
 0x9fb   :  { %v3894_v42 = vpop.eup %3893  ;;  %v2247_v61 = vmul.f32 %v3892_v23, %v2235_v32 }
 0x9fc   :  { %v2246_v38 = vmul.f32 %v3894_v42, %v2234_v15  ;;  %3769 = vmatprep.subr.bf16.mxu0 %v3768_v39  ;;  %3777 = vmatprep.subr.bf16.mxu1 %v3768_v39 }
 0x9fd   :  { %v2255_v59 = vmul.f32 %v2251_v45, %v2247_v61  ;;  %3771 = vmatpush3.bf16.msra.mxu0 %v3768_v39  ;;  %3779 = vmatpush3.bf16.msra.mxu1 %v3768_v39 }
 0x9fe   :  { %v2254_v16 = vmul.f32 %v2251_v45, %v2246_v38 }
 0x9ff   :  { %v2263_v18 = vadd.f32 %v2259_v28, %v2255_v59 }
 0xa00   :  { %v4587_v51 = vadd.f32 %v2259_v28, %v2254_v16 }
 0xa02   :  { %v3772_v20 = vpack.c.bf16 %v2263_v18, %v4587_v51 }
 0xa04   :  { %3773 = vmatprep.subr.bf16.mxu0 %v3772_v20  ;;  %3781 = vmatprep.subr.bf16.mxu1 %v3772_v20 }
 0xa05   :  { %3775 = vmatpush3.bf16.msra.mxu0 %v3772_v20  ;;  %3783 = vmatpush3.bf16.msra.mxu1 %v3772_v20 }
 0xa06   :  { %3785 = vmatprep.subr.bf16.mxu0 %v3768_v39  ;;  %3793 = vmatprep.subr.bf16.mxu1 %v3768_v39 }
 0xa08   :  { %3565 = vmatmul.mubr.msk.f32.vlgmr.msra.gmra.mrb[32].mxu0 %vm183_vm0, %v4167_v50  ;;  %3579 = vmatmul.mubr.msk.f32.vlgmr.msra.gmra.mrb[32].mxu1 %vm183_vm0, %v4174_v53  ;;  %v2671_v50 = vld [vmem:[#allocation7 + $0x60] sm:$0xff]  ;;  %v2672_v53 = vld [vmem:[#allocation7 + $0x68] sm:$0xff] }
 0xa09   :  { %3787 = vmatpush3.bf16.msra.mxu0 %v3768_v39  ;;  %3795 = vmatpush3.bf16.msra.mxu1 %v3768_v39 }
 0xa0a   :  { %3789 = vmatprep.subr.bf16.mxu0 %v3772_v20  ;;  %3797 = vmatprep.subr.bf16.mxu1 %v3772_v20 }
 0xa0b   :  { %3567 = vmatprep.mubr.msk.f32.mxu0 %vm183_vm0, %v4179_v56  ;;  %3581 = vmatprep.mubr.msk.f32.mxu1 %vm183_vm0, %v4185_v58  ;;  %v3800_v56 = vpack.c.bf16 %v2672_v53, %v2671_v50  ;;  %v2674_v58 = vld [vmem:[#allocation7 + $0x78] sm:$0xff] }
 0xa0c   :  { %3568 = vmatmul.mubr.msk.f32.gmra.mrb[34].mxu0 %vm183_vm0, %v4183_v57  ;;  %3582 = vmatmul.mubr.msk.f32.gmra.mrb[34].mxu1 %vm183_vm0, %v4189_v60  ;;  %v2673_v57 = vld [vmem:[#allocation7 + $0x70] sm:$0xff] }
 0xa0d   :  { %3791 = vmatpush3.bf16.msra.mxu0 %v3772_v20  ;;  %3799 = vmatpush3.bf16.msra.mxu1 %v3772_v20  ;;  %v3804_v60 = vpack.c.bf16 %v2674_v58, %v2673_v57 }
 0xa0e   :  { %3592 = vmatprep.mubr.msk.f32.mxu0 %vm183_vm0, %v4193_v0  ;;  %3606 = vmatprep.mubr.msk.f32.mxu1 %vm183_vm0, %v4198_v1  ;;  %v3130_v0 = vld [vmem:[%s4743_s2 + $0x18] sm:$0x1f] }
 0xa0f   :  { %3801 = vmatprep.subr.bf16.mxu0 %v3800_v56  ;;  %v2269_v1 = vrot.slane %v3130_v0, %v4227_v55  ;;  %v2556_v33 = vrot.slane %v3130_v0, %v4283_v40  ;;  %v2653_v46 = vrot.slane %v3130_v0, %v4287_v48  ;;  %v2665_v48 = vrot.slane %v4405_v24, %v1400_v37 }
 0xa10   :  { %3593 = vmatmul.mubr.msk.f32.vlgmr.msra.gmra.mrb[36].mxu0 %vm183_vm0, %v4201_v3  ;;  %3607 = vmatmul.mubr.msk.f32.vlgmr.msra.gmra.mrb[36].mxu1 %vm183_vm0, %v4204_v5  ;;  %v2362_v3 = vrot.slane %v3130_v0, %v4114_v12  ;;  %v2459_v5 = vrot.slane %v3130_v0, %v4221_v44  ;;  %v2678_v24 = vrot.slane %v4474_v41, %v4114_v12 }
 0xa11   :  { %3595 = vmatprep.mubr.msk.f32.mxu0 %vm183_vm0, %v4207_v8  ;;  %3609 = vmatprep.mubr.msk.f32.mxu1 %vm183_vm0, %v4215_v10  ;;  %v2271_v10 = vmul.f32 %v2269_v1, %v2261_v54  ;;  %v2270_v17 = vmul.f32 %v2269_v1, %v4582_v63  ;;  %v2273_v47 = vmul.f32 %v2269_v1, %v2263_v18 }
 0xa12   :  { %3803 = vmatpush3.bf16.msra.mxu0 %v3800_v56  ;;  %v2272_v30 = vmul.f32 %v2269_v1, %v4587_v51 }
 0xa13   :  { %3805 = vmatprep.subr.bf16.mxu0 %v3804_v60 }
 0xa14   :  { %3596 = vmatmul.mubr.msk.f32.gmra.mrb[38].mxu0 %vm183_vm0, %v4213_v9  ;;  %3610 = vmatmul.mubr.msk.f32.gmra.mrb[38].mxu1 %vm183_vm0, %v4218_v14 }
 0xa16   :  { %3807 = vmatpush3.bf16.msra.mxu0 %v3804_v60 }
 0xadb   :  { %v3566_v8 = vpop.f32.mrb[32].mxu0  ;;  %v3580_v9 = vpop.f32.mrb[32].mxu1 }
 0xadc   :  { %v2364_v14 = vmul.f32 %v3566_v8, %v2362_v3  ;;  %v2340_v49 = vpop.f32.mrb[33].mxu0  ;;  %v2461_v7 = vmul.f32 %v3580_v9, %v2459_v5  ;;  %v2437_v6 = vpop.f32.mrb[33].mxu1 }
 0xadd   :  { %v2363_v26 = vmul.f32 %v2362_v3, %v2340_v49  ;;  %v2460_v25 = vmul.f32 %v2459_v5, %v2437_v6 }
 0xade   :  { %v2368_v22 = vadd.f32 %v2364_v14, %v2271_v10 }
 0xadf   :  { %v2367_v35 = vadd.f32 %v2363_v26, %v2270_v17  ;;  %v3569_v4 = vpop.f32.mrb[34].mxu0  ;;  %v3583_v19 = vpop.f32.mrb[34].mxu1 }
 0xae0   :  { %v2465_v45 = vadd.f32 %v2461_v7, %v2368_v22  ;;  %v2366_v62 = vmul.f32 %v3569_v4, %v2362_v3  ;;  %v2350_v2 = vpop.f32.mrb[35].mxu0  ;;  %v2463_v31 = vmul.f32 %v3583_v19, %v2459_v5  ;;  %v2447_v28 = vpop.f32.mrb[35].mxu1 }
 0xae1   :  { %v2464_v27 = vadd.f32 %v2460_v25, %v2367_v35  ;;  %v2365_v29 = vmul.f32 %v2362_v3, %v2350_v2  ;;  %v2462_v54 = vmul.f32 %v2459_v5, %v2447_v28 }
 0xae2   :  { %v2370_v63 = vadd.f32 %v2366_v62, %v2273_v47 }
 0xae3   :  { %v2369_v32 = vadd.f32 %v2365_v29, %v2272_v30  ;;  %v3594_v23 = vpop.f32.mrb[36].mxu0  ;;  %v3608_v39 = vpop.f32.mrb[36].mxu1 }
 0xae4   :  { %v2467_v15 = vadd.f32 %v2463_v31, %v2370_v63  ;;  %v2558_v42 = vmul.f32 %v3594_v23, %v2556_v33  ;;  %v2534_v61 = vpop.f32.mrb[37].mxu0  ;;  %v2655_v40 = vmul.f32 %v3608_v39, %v2653_v46  ;;  %v2631_v38 = vpop.f32.mrb[37].mxu1 }
 0xae5   :  { %v2466_v59 = vadd.f32 %v2462_v54, %v2369_v32  ;;  %v2557_v16 = vmul.f32 %v2556_v33, %v2534_v61  ;;  %v2654_v18 = vmul.f32 %v2653_v46, %v2631_v38 }
 0xae6   :  { %v2562_v20 = vadd.f32 %v2558_v42, %v2465_v45 }
 0xae7   :  { %v2561_v50 = vadd.f32 %v2557_v16, %v2464_v27  ;;  %v3597_v51 = vpop.f32.mrb[38].mxu0  ;;  %v3611_v53 = vpop.f32.mrb[38].mxu1 }
 0xae8   :  { %v2659_v56 = vadd.f32 %v2655_v40, %v2562_v20  ;;  %v2560_v57 = vmul.f32 %v3597_v51, %v2556_v33  ;;  %v2544_v58 = vpop.f32.mrb[39].mxu0  ;;  %v2657_v60 = vmul.f32 %v3611_v53, %v2653_v46  ;;  %v2641_v0 = vpop.f32.mrb[39].mxu1 }
 0xae9   :  { %v2658_v1 = vadd.f32 %v2654_v18, %v2561_v50  ;;  %v2559_v3 = vmul.f32 %v2556_v33, %v2544_v58  ;;  %v2656_v5 = vmul.f32 %v2653_v46, %v2641_v0 }
 0xaea   :  { %v2564_v8 = vadd.f32 %v2560_v57, %v2467_v15  ;;  %v2667_v14 = vadd.f32 %v2665_v48, %v2659_v56 }
 0xaeb   :  { %v2666_v9 = vadd.f32 %v2665_v48, %v2658_v1  ;;  %v2563_v10 = vadd.f32 %v2559_v3, %v2466_v59 }
 0xaec   :  { %v2661_v49 = vadd.f32 %v2657_v60, %v2564_v8 }
 0xaed   :  { %v2660_v7 = vadd.f32 %v2656_v5, %v2563_v10  ;;  %3620 = vmatprep.mubr.msk.f32.mxu0 %vm183_vm0, %v2666_v9 }
 0xaee   :  { %3621 = vmatmul.mubr.msk.f32.vlgmr.msra.gmra.mrb[40].mxu0 %vm183_vm0, %v2667_v14  ;;  %v2669_v37 = vadd.f32 %v2665_v48, %v2661_v49 }
 0xaef   :  { %v2668_v11 = vadd.f32 %v2665_v48, %v2660_v7 }
 0xaf1   :  { %3623 = vmatprep.mubr.msk.f32.mxu0 %vm183_vm0, %v2668_v11 }
 0xaf2   :  { %3624 = vmatmul.mubr.msk.f32.gmra.mrb[42].mxu0 %vm183_vm0, %v2669_v37  ;;  %v2843_v37 = vrot.slane %v4474_v41, %v4221_v44 }
 0xbc1   :  { %v3622_v6 = vpop.f32.mrb[40].mxu0 }
 0xbc2   :  { %v2763_v17 = vadd.f32 %v3622_v6, %v2678_v24  ;;  %v2757_v26 = vpop.f32.mrb[41].mxu0 }
 0xbc3   :  { %v2758_v25 = vadd.f32 %v2757_v26, %v2678_v24 }
 0xbc4   :  { %3895 = vtanh.f32 %v2763_v17 }
 0xbc5   :  { %3897 = vtanh.f32 %v2758_v25  ;;  %v3625_v22 = vpop.f32.mrb[42].mxu0  ;;  %v2851_v25 = vrot.slane %v4474_v41, %v4227_v55 }
 0xbc6   :  { %v2773_v35 = vadd.f32 %v3625_v22, %v2678_v24  ;;  %v2767_v47 = vpop.f32.mrb[43].mxu0 }
 0xbc7   :  { %v2768_v4 = vadd.f32 %v2767_v47, %v2678_v24 }
 0xbc8   :  { %3899 = vtanh.f32 %v2773_v35 }
 0xbc9   :  { %3901 = vtanh.f32 %v2768_v4 }
 0xbce   :  { %v3896_v19 = vpop.eup %3895 }
 0xbcf   :  { %v4637_v33 = vpop.eup %3897  ;;  %v2783_v45 = vsel %vm183_vm0, %v3896_v19, 0.0  ;;  %v2797_v62 = vmul.f32 %v3896_v19, %v3896_v19 }
 0xbd0   :  { %2784 = vadd.xlane.f32.xlu1 %v2783_v45  ;;  %v2780_v12 = vsel %vm183_vm0, %v4637_v33, 0.0  ;;  %v2796_v2 = vmul.f32 %v4637_v33, %v4637_v33 }
 0xbd1   :  { %2781 = vadd.xlane.f32.xlu0 %v2780_v12  ;;  %v2803_v31 = vsel %vm183_vm0, %v2797_v62, 0.0 }
 0xbd2   :  { %v4645_v28 = vpop.eup %3899  ;;  %v2800_v46 = vsel %vm183_vm0, %v2796_v2, 0.0 }
 0xbd3   :  { %v4648_v27 = vpop.eup %3901  ;;  %v2789_v30 = vsel %vm183_vm0, %v4645_v28, 0.0  ;;  %v2799_v29 = vmul.f32 %v4645_v28, %v4645_v28 }
 0xbd4   :  { %2804 = vadd.xlane.f32.xlu1 %v2803_v31  ;;  %v2786_v54 = vsel %vm183_vm0, %v4648_v27, 0.0  ;;  %v2798_v63 = vmul.f32 %v4648_v27, %v4648_v27 }
 0xbd5   :  { %2801 = vadd.xlane.f32.xlu0 %v2800_v46  ;;  %v2809_v32 = vsel %vm183_vm0, %v2799_v29, 0.0 }
 0xbd6   :  { %v2806_v23 = vsel %vm183_vm0, %v2798_v63, 0.0 }
 0xbd8   :  { %2790 = vadd.xlane.f32.xlu1 %v2789_v30 }
 0xbd9   :  { %2787 = vadd.xlane.f32.xlu0 %v2786_v54 }
 0xbdc   :  { %2810 = vadd.xlane.f32.xlu1 %v2809_v32 }
 0xbdd   :  { %2807 = vadd.xlane.f32.xlu0 %v2806_v23 }
 0xc5d   :  { %v2785_v39 = vpop.xlane.xlu1 %2784 }
 0xc5e   :  { %v2793_v15 = vmul.f32 0.03125, %v2785_v39  ;;  %v2782_v42 = vpop.xlane.xlu0 %2781 }
 0xc5f   :  { %v2792_v61 = vmul.f32 0.03125, %v2782_v42 }
 0xc60   :  { %v2817_v38 = vmul.f32 %v2793_v15, %v2793_v15  ;;  %v2825_v11 = vsub.f32 %v3896_v19, %v2793_v15 }
 0xc61   :  { %v2805_v40 = vpop.xlane.xlu1 %2804  ;;  %v2816_v18 = vmul.f32 %v2792_v61, %v2792_v61  ;;  %v2824_v6 = vsub.f32 %v4637_v33, %v2792_v61 }
 0xc62   :  { %v2813_v59 = vmul.f32 0.03125, %v2805_v40  ;;  %v2802_v16 = vpop.xlane.xlu0 %2801 }
 0xc63   :  { %v2812_v20 = vmul.f32 0.03125, %v2802_v16 }
 0xc64   :  { %v2821_v50 = vsub.f32 %v2813_v59, %v2817_v38  ;;  %v2936_v38 = vld [vmem:[%s4746_s5] sm:$0xff]  ;;  %v2937_v59 = vld [vmem:[%s4746_s5 + $0x8] sm:$0xff] }
 0xc65   :  { %v2820_v48 = vsub.f32 %v2812_v20, %v2816_v18  ;;  %v2791_v51 = vpop.xlane.xlu1 %2790  ;;  %v3808_v16 = vpack.c.bf16 %v2937_v59, %v2936_v38  ;;  %v2938_v18 = vld [vmem:[%s4746_s5 + $0x10] sm:$0xff]  ;;  %v2939_v20 = vld [vmem:[%s4746_s5 + $0x18] sm:$0xff] }
 0xc66   :  { %v2829_v53 = vadd.f32 1e-05, %v2821_v50  ;;  %v2795_v56 = vmul.f32 0.03125, %v2791_v51  ;;  %v2788_v57 = vpop.xlane.xlu0 %2787  ;;  %v3812_v50 = vpack.c.bf16 %v2939_v20, %v2938_v18 }
 0xc67   :  { %v2828_v58 = vadd.f32 1e-05, %v2820_v48  ;;  %v2794_v60 = vmul.f32 0.03125, %v2788_v57  ;;  %3809 = vmatprep.subr.bf16.mxu1 %v3808_v16 }
 0xc68   :  { %3903 = vrsqrt.f32 %v2829_v53  ;;  %v2819_v1 = vmul.f32 %v2795_v56, %v2795_v56  ;;  %v2827_v62 = vsub.f32 %v4645_v28, %v2795_v56  ;;  %3811 = vmatpush3.bf16.msra.mxu1 %v3808_v16 }
 0xc69   :  { %3905 = vrsqrt.f32 %v2828_v58  ;;  %v2811_v0 = vpop.xlane.xlu1 %2810  ;;  %v2818_v8 = vmul.f32 %v2794_v60, %v2794_v60  ;;  %v2826_v44 = vsub.f32 %v4648_v27, %v2794_v60  ;;  %3813 = vmatprep.subr.bf16.mxu1 %v3812_v50 }
 0xc6a   :  { %v2815_v3 = vmul.f32 0.03125, %v2811_v0  ;;  %v2808_v5 = vpop.xlane.xlu0 %2807 }
 0xc6b   :  { %v2814_v9 = vmul.f32 0.03125, %v2808_v5 }
 0xc6c   :  { %v2823_v10 = vsub.f32 %v2815_v3, %v2819_v1  ;;  %3815 = vmatpush3.bf16.msra.mxu1 %v3812_v50 }
 0xc6d   :  { %v2822_v14 = vsub.f32 %v2814_v9, %v2818_v8 }
 0xc6e   :  { %v2831_v49 = vadd.f32 1e-05, %v2823_v10 }
 0xc6f   :  { %v2830_v7 = vadd.f32 1e-05, %v2822_v14 }
 0xc70   :  { %3907 = vrsqrt.f32 %v2831_v49 }
 0xc71   :  { %3909 = vrsqrt.f32 %v2830_v7 }
 0xc72   :  { %v3904_v24 = vpop.eup %3903 }
 0xc73   :  { %v3906_v17 = vpop.eup %3905  ;;  %v2837_v26 = vmul.f32 %v3904_v24, %v2825_v11 }
 0xc74   :  { %v2836_v22 = vmul.f32 %v3906_v17, %v2824_v6 }
 0xc75   :  { %v2845_v35 = vmul.f32 %v2843_v37, %v2837_v26 }
 0xc76   :  { %v2844_v47 = vmul.f32 %v2843_v37, %v2836_v22 }
 0xc77   :  { %v2853_v4 = vadd.f32 %v2851_v25, %v2845_v35 }
 0xc78   :  { %v2852_v45 = vadd.f32 %v2851_v25, %v2844_v47 }
 0xc79   :  { %v4667_v19 = vadd.f32 %v2853_v4, %v4482_v13 }
 0xc7a   :  { %v3908_v12 = vpop.eup %3907  ;;  %v4671_v33 = vadd.f32 %v2852_v45, %v4484_v21 }
 0xc7b   :  { %v3910_v2 = vpop.eup %3909  ;;  %v2863_v55 = vsel %vm183_vm0, %v4667_v19, 0.0  ;;  %v2877_v31 = vmul.f32 %v4667_v19, %v4667_v19  ;;  %v2839_v46 = vmul.f32 %v3908_v12, %v2827_v62  ;;  %v2923_v62 = vrot.slane %v4474_v41, %v4333_v43 }
 0xc7c   :  { %2864 = vadd.xlane.f32.xlu1 %v2863_v55  ;;  %v2860_v28 = vsel %vm183_vm0, %v4671_v33, 0.0  ;;  %v2876_v13 = vmul.f32 %v4671_v33, %v4671_v33  ;;  %v2838_v30 = vmul.f32 %v3910_v2, %v2826_v44 }
 0xc7d   :  { %2861 = vadd.xlane.f32.xlu0 %v2860_v28  ;;  %v2847_v27 = vmul.f32 %v2843_v37, %v2839_v46  ;;  %v2883_v29 = vsel %vm183_vm0, %v2877_v31, 0.0  ;;  %v2931_v46 = vrot.slane %v4474_v41, %v4336_v36  ;;  %v3151_v41 = vld [vmem:[%s4746_s5 + $0x20] ss:$0 sm:$0xff] }
 0xc7e   :  { %v2846_v21 = vmul.f32 %v2843_v37, %v2838_v30  ;;  %v2880_v63 = vsel %vm183_vm0, %v2876_v13, 0.0 }
 0xc7f   :  { %v2855_v54 = vadd.f32 %v2851_v25, %v2847_v27 }
 0xc80   :  { %2884 = vadd.xlane.f32.xlu1 %v2883_v29  ;;  %v2854_v32 = vadd.f32 %v2851_v25, %v2846_v21 }
 0xc81   :  { %2881 = vadd.xlane.f32.xlu0 %v2880_v63  ;;  %v4684_v23 = vadd.f32 %v2855_v54, %v4490_v34 }
 0xc82   :  { %v4687_v39 = vadd.f32 %v2854_v32, %v4492_v52 }
 0xc83   :  { %v2869_v15 = vsel %vm183_vm0, %v4684_v23, 0.0  ;;  %v2879_v42 = vmul.f32 %v4684_v23, %v4684_v23 }
 0xc84   :  { %2870 = vadd.xlane.f32.xlu1 %v2869_v15  ;;  %v2866_v61 = vsel %vm183_vm0, %v4687_v39, 0.0  ;;  %v2878_v40 = vmul.f32 %v4687_v39, %v4687_v39 }
 0xc85   :  { %2867 = vadd.xlane.f32.xlu0 %v2866_v61  ;;  %v2889_v34 = vsel %vm183_vm0, %v2879_v42, 0.0 }
 0xc86   :  { %v2886_v52 = vsel %vm183_vm0, %v2878_v40, 0.0 }
 0xc88   :  { %2890 = vadd.xlane.f32.xlu1 %v2889_v34 }
 0xc89   :  { %2887 = vadd.xlane.f32.xlu0 %v2886_v52 }
 0xd09   :  { %v2865_v48 = vpop.xlane.xlu1 %2864 }
 0xd0a   :  { %v2873_v51 = vmul.f32 0.03125, %v2865_v48  ;;  %v2862_v53 = vpop.xlane.xlu0 %2861 }
 0xd0b   :  { %v2872_v56 = vmul.f32 0.03125, %v2862_v53 }
 0xd0c   :  { %v2897_v58 = vmul.f32 %v2873_v51, %v2873_v51  ;;  %v2905_v45 = vsub.f32 %v4667_v19, %v2873_v51 }
 0xd0d   :  { %v2885_v57 = vpop.xlane.xlu1 %2884  ;;  %v2896_v1 = vmul.f32 %v2872_v56, %v2872_v56  ;;  %v2904_v44 = vsub.f32 %v4671_v33, %v2872_v56 }
 0xd0e   :  { %v2893_v60 = vmul.f32 0.03125, %v2885_v57  ;;  %v2882_v0 = vpop.xlane.xlu0 %2881 }
 0xd0f   :  { %v2892_v3 = vmul.f32 0.03125, %v2882_v0 }
 0xd10   :  { %v2901_v5 = vsub.f32 %v2893_v60, %v2897_v58 }
 0xd11   :  { %v2900_v8 = vsub.f32 %v2892_v3, %v2896_v1  ;;  %v2871_v9 = vpop.xlane.xlu1 %2870 }
 0xd12   :  { %v2909_v10 = vadd.f32 1e-05, %v2901_v5  ;;  %v2875_v14 = vmul.f32 0.03125, %v2871_v9  ;;  %v2868_v49 = vpop.xlane.xlu0 %2867 }
 0xd13   :  { %v2908_v7 = vadd.f32 1e-05, %v2900_v8  ;;  %v2874_v11 = vmul.f32 0.03125, %v2868_v49 }
 0xd14   :  { %3911 = vrsqrt.f32 %v2909_v10  ;;  %v2899_v24 = vmul.f32 %v2875_v14, %v2875_v14  ;;  %v2907_v27 = vsub.f32 %v4684_v23, %v2875_v14 }
 0xd15   :  { %3913 = vrsqrt.f32 %v2908_v7  ;;  %v2891_v37 = vpop.xlane.xlu1 %2890  ;;  %v2898_v26 = vmul.f32 %v2874_v11, %v2874_v11  ;;  %v2906_v29 = vsub.f32 %v4687_v39, %v2874_v11 }
 0xd16   :  { %v2895_v6 = vmul.f32 0.03125, %v2891_v37  ;;  %v2888_v17 = vpop.xlane.xlu0 %2887 }
 0xd17   :  { %v2894_v25 = vmul.f32 0.03125, %v2888_v17 }
 0xd18   :  { %v2903_v22 = vsub.f32 %v2895_v6, %v2899_v24 }
 0xd19   :  { %v2902_v35 = vsub.f32 %v2894_v25, %v2898_v26 }
 0xd1a   :  { %v2911_v47 = vadd.f32 1e-05, %v2903_v22 }
 0xd1b   :  { %v2910_v4 = vadd.f32 1e-05, %v2902_v35 }
 0xd1c   :  { %3915 = vrsqrt.f32 %v2911_v47 }
 0xd1d   :  { %3917 = vrsqrt.f32 %v2910_v4 }
 0xd1e   :  { %v3912_v12 = vpop.eup %3911 }
 0xd1f   :  { %v3914_v2 = vpop.eup %3913  ;;  %v2917_v55 = vmul.f32 %v3912_v12, %v2905_v45 }
 0xd20   :  { %v2916_v31 = vmul.f32 %v3914_v2, %v2904_v44 }
 0xd21   :  { %v2925_v28 = vmul.f32 %v2923_v62, %v2917_v55 }
 0xd22   :  { %v2924_v13 = vmul.f32 %v2923_v62, %v2916_v31 }
 0xd23   :  { %v2933_v21 = vadd.f32 %v2931_v46, %v2925_v28 }
 0xd24   :  { %v2932_v30 = vadd.f32 %v2931_v46, %v2924_v13 }
 0xd26   :  { %v3916_v19 = vpop.eup %3915  ;;  %3634 = vmatprep.mubr.msk.f32.mxu1 %vm183_vm0, %v2932_v30 }
 0xd27   :  { %v3918_v43 = vpop.eup %3917  ;;  %3635 = vmatmul.mubr.msk.f32.vlgmr.msra.gmra.mrb[40].mxu1 %vm183_vm0, %v2933_v21  ;;  %v2919_v33 = vmul.f32 %v3916_v19, %v2907_v27 }
 0xd28   :  { %v2918_v54 = vmul.f32 %v3918_v43, %v2906_v29 }
 0xd29   :  { %v2927_v63 = vmul.f32 %v2923_v62, %v2919_v33 }
 0xd2a   :  { %v2926_v32 = vmul.f32 %v2923_v62, %v2918_v54 }
 0xd2b   :  { %v2935_v36 = vadd.f32 %v2931_v46, %v2927_v63 }
 0xd2c   :  { %v2934_v15 = vadd.f32 %v2931_v46, %v2926_v32 }
 0xd2e   :  { %3637 = vmatprep.mubr.msk.f32.mxu1 %vm183_vm0, %v2934_v15 }
 0xd2f   :  { %3638 = vmatmul.mubr.msk.f32.gmra.mrb[42].mxu1 %vm183_vm0, %v2935_v36 }
 0xdfa   :  { %v3636_v23 = vpop.f32.mrb[40].mxu1 }
 0xdfb   :  { %v3029_v39 = vadd.f32 %v3636_v23, %v3151_v41  ;;  %v3023_v42 = vpop.f32.mrb[41].mxu1 }
 0xdfc   :  { %v3024_v61 = vadd.f32 %v3151_v41, %v3023_v42 }
 0xdfd   :  { %3043 = vst [vmem:[#allocation8 + $0x8] sm:$0xff] %v3029_v39 }
 0xdfe   :  { %3042 = vst [vmem:[#allocation8] sm:$0xff] %v3024_v61 }
 0xe02   :  { %v3639_v40 = vpop.f32.mrb[42].mxu1 }
 0xe03   :  { %v3039_v34 = vadd.f32 %v3639_v40, %v3151_v41  ;;  %v3033_v52 = vpop.f32.mrb[43].mxu1 }
 0xe04   :  { %v3034_v38 = vadd.f32 %v3151_v41, %v3033_v52 }
 0xe05   :  { %3045 = vst [vmem:[#allocation8 + $0x18] sm:$0xff] %v3039_v34 }
 0xe06   :  { %3044 = vst [vmem:[#allocation8 + $0x10] sm:$0xff] %v3034_v38 }
 0xe07   :  { %3996 = shalt.err (!%p3993_p0)
}
 0xe08   :  { %s3997_s11 = scalar_lea.hbm %s4747_s6, 512 }
 0xe09   :  { %p3998_p1 = scmp.ne.s32.totalorder %s4747_s6, %s3997_s11  ;;  %p4001_p2 = scmp.lt.u32.totalorder %s3997_s11, %s4747_s6 }
 0xe0b   :  { %p4003_p3 = pnand %p4001_p2, %p3998_p1 }
 0xe0d   :  { %4006 = shalt.err (!%p4003_p3)
}
 0xe0e   :  { %3057 = dma.vmem_to_hbm [thread:$0]  %s3052_s0, 512, %s4747_s6, [#allocation4], %s4015_s9, %s4015_s9, %s4016_s10  }
 0xe0f   :  { %4011 = dma.done.wait [#allocation4], 512  }
 0xe10   :  { %4012 = vsyncadd [#allocation4], 4294966784 }
 0xe11   :  { %3061 = vsyncpa [#allocation3], 1 }
 0xe12   :  { %3062 = vsyncpa [#allocation6], 1 }
 0xe13   :  { %3063 = vsyncpa [#allocation4], 1 }

</bundles_post_ra>
